<compile_context>
chip_gen: v7x
topology: tpu7x:2x2x1
jax: 0.10.0
libtpu: 0.0.40
codegen_flags: <defaults>
</compile_context>

<pallas_src>
import jax
import jax.numpy as jnp
from jax.experimental import pallas as pl
from jax.experimental.pallas import tpu as pltpu


LANE = 128
SUBLANE = 8


# ----------------------------- utilities ------------------------------------

def _round_up(n, m):
    return ((n + m - 1) // m) * m


def _pad2(a, rows, cols):
    r, c = a.shape
    return jnp.pad(a, ((0, rows - r), (0, cols - c)))


# ----------------------------- kernel ----------------------------------------

def _make_hgnn_kernel(compute_dtype):
    def kernel(g_ref, p_ref, wl1_ref, bl1_ref, wl2_ref, bl2_ref, out_ref, emb_ref):
        # Full-width reduction for this row tile: one MXU dot.  G arrives in its
        # native HBM dtype and is cast per-tile here (no wrapper pass over G).
        g = g_ref[...].astype(compute_dtype)
        h = jnp.dot(g, p_ref[...], preferred_element_type=jnp.float32)   # (tm, n_hid_p) f32
        h = jnp.maximum(h, 0.0)                                          # ReLU (VPU, f32)
        # TODO(synk): F.dropout treated as identity (inference path); a training
        # kernel would draw a mask with pltpu.prng_seed / pltpu.prng_random_bits.
        emb_ref[...] = h.astype(emb_ref.dtype)                           # x_embedding writeback
        y = jnp.dot(h.astype(compute_dtype), wl1_ref[...],
                    preferred_element_type=jnp.float32)
        y = jnp.maximum(y + bl1_ref[...], 0.0)                           # Linear(n_hid,32)+ReLU
        z = jnp.dot(y.astype(compute_dtype), wl2_ref[...],
                    preferred_element_type=jnp.float32)
        out_ref[...] = (z + bl2_ref[...]).astype(out_ref.dtype)          # Linear(32, 2)
    return kernel


# ----------------------------- wrapper ----------------------------------------

def hgnn_forward(x, G, params, *, use_bf16=True, tm_target=512):
    """x: [N, in_ch] f32, G: [N, N] (f32 or bf16). Returns (out [N,2] f32, emb [N,n_hid] f32)."""
    w1, b1, wl1, bl1, wl2, bl2 = params
    N, _ = x.shape
    n_hid = w1.shape[1]
    hid2 = wl1.shape[1]      # 32
    n_out = wl2.shape[1]     # 2

    compute_dtype = jnp.bfloat16 if use_bf16 else jnp.float32
    emb_dtype = jnp.bfloat16 if use_bf16 else jnp.float32     # halved emb writeback (review)
    c_bytes = jnp.dtype(compute_dtype).itemsize
    g_bytes = jnp.dtype(G.dtype).itemsize
    e_bytes = jnp.dtype(emb_dtype).itemsize

    n_hid_p = _round_up(n_hid, LANE)
    hid2_p = _round_up(hid2, LANE)
    out_p = _round_up(n_out, LANE)
    nk = _round_up(N, LANE)               # reduction dim (G cols / p rows), lane aligned

    # Row-tile size: as big as the VMEM budget allows, 8-aligned, and >= 2 row
    # tiles whenever possible so v7x's two TensorCores both get work.
    tm_cap = max(SUBLANE, ((24 << 20) // (2 * nk * g_bytes)) // SUBLANE * SUBLANE)
    tm = max(SUBLANE, min(tm_target, tm_cap, _round_up(pl.cdiv(N, 2), SUBLANE)))
    gi = pl.cdiv(N, tm)
    tm = _round_up(pl.cdiv(N, gi), SUBLANE)      # shrink back so rows_pad hugs N
    rows_pad = gi * tm
    # TODO(synk): for very large N (full-width G tile / resident p no longer fit
    # VMEM) a k-tiled accumulator variant would be needed; out of scope here.

    # ---- Stage A (tiny, <1% of work): p = x @ W1 + b1, plain jnp per review ----
    p = jnp.dot(x, w1, preferred_element_type=jnp.float32) + b1
    p = _pad2(p, nk, n_hid_p).astype(compute_dtype)   # zero rows >= N, zero lanes >= n_hid

    # ---- G: stream in native dtype. Pad only when N is not already aligned. ----
    if (rows_pad, nk) != G.shape:
        # Single minimal pad; production callers should cache a pre-padded (and
        # ideally bf16) G outside the hot path to make this a true zero-copy stream.
        G_in = _pad2(G, rows_pad, nk)
    else:
        G_in = G                                      # zero-copy path

    wl1_p = _pad2(wl1, n_hid_p, hid2_p).astype(compute_dtype)
    bl1_p = _pad2(bl1.reshape(1, -1), 1, hid2_p).astype(jnp.float32)
    wl2_p = _pad2(wl2, hid2_p, out_p).astype(compute_dtype)
    bl2_p = _pad2(bl2.reshape(1, -1), 1, out_p).astype(jnp.float32)

    vmem_need = (2 * tm * nk * g_bytes                            # G tile, double-buffered
                 + 2 * nk * n_hid_p * c_bytes                     # resident p
                 + 2 * (n_hid_p * hid2_p + hid2_p * out_p) * c_bytes
                 + 2 * (hid2_p + out_p) * 4
                 + 2 * tm * (out_p * 4 + n_hid_p * e_bytes))      # output blocks
    vmem_limit = int(min(max(2 * vmem_need + (4 << 20), 16 << 20), 40 << 20))

    flops = 2 * rows_pad * nk * n_hid_p + 2 * rows_pad * (n_hid_p * hid2_p + hid2_p * out_p)
    bytes_accessed = (rows_pad * nk * g_bytes + nk * n_hid_p * c_bytes
                      + rows_pad * (out_p * 4 + n_hid_p * e_bytes))

    out_pad, emb_pad = pl.pallas_call(
        _make_hgnn_kernel(compute_dtype),
        out_shape=(jax.ShapeDtypeStruct((rows_pad, out_p), jnp.float32),
                   jax.ShapeDtypeStruct((rows_pad, n_hid_p), emb_dtype)),
        grid=(gi,),
        in_specs=[
            pl.BlockSpec((tm, nk), lambda i: (i, 0)),           # G row tile (full width)
            pl.BlockSpec((nk, n_hid_p), lambda i: (0, 0)),      # p: VMEM-resident, loaded once
            pl.BlockSpec((n_hid_p, hid2_p), lambda i: (0, 0)),  # Wl1
            pl.BlockSpec((1, hid2_p), lambda i: (0, 0)),        # bl1
            pl.BlockSpec((hid2_p, out_p), lambda i: (0, 0)),    # Wl2
            pl.BlockSpec((1, out_p), lambda i: (0, 0)),         # bl2
        ],
        out_specs=(pl.BlockSpec((tm, out_p), lambda i: (i, 0)),
                   pl.BlockSpec((tm, n_hid_p), lambda i: (i, 0))),
        compiler_params=pltpu.CompilerParams(
            dimension_semantics=("parallel",),
            vmem_limit_bytes=vmem_limit),
        cost_estimate=pl.CostEstimate(flops=int(flops), transcendentals=0,
                                      bytes_accessed=int(bytes_accessed)),
    )(G_in, p, wl1_p, bl1_p, wl2_p, bl2_p)

    out = out_pad[:N, :n_out]
    emb = emb_pad[:N, :n_hid].astype(jnp.float32)
    return out, emb


# ----------------------------- reference & test -------------------------------

def init_params(key, in_ch, n_hid):
    k1, k2, k3, k4, k5, k6 = jax.random.split(key, 6)
    w1 = jax.random.normal(k1, (in_ch, n_hid), jnp.float32) * (1.0 / float(in_ch) ** 0.5)
    b1 = 0.1 * jax.random.normal(k2, (1, n_hid), jnp.float32)
    wl1 = jax.random.normal(k3, (n_hid, 32), jnp.float32) * (1.0 / float(n_hid) ** 0.5)
    bl1 = 0.1 * jax.random.normal(k4, (1, 32), jnp.float32)
    wl2 = jax.random.normal(k5, (32, 2), jnp.float32) * (1.0 / float(32) ** 0.5)
    bl2 = 0.1 * jax.random.normal(k6, (1, 2), jnp.float32)
    return (w1, b1, wl1, bl1, wl2, bl2)


def reference_forward(x, G, params):
    w1, b1, wl1, bl1, wl2, bl2 = params
    hp = jax.lax.Precision.HIGHEST
    dot = lambda a, b: jnp.dot(a, b, precision=hp)
    h = jnp.maximum(dot(G, dot(x, w1) + b1), 0.0)
    y = jnp.maximum(dot(h, wl1) + bl1, 0.0)
    return dot(y, wl2) + bl2, h


def _max_rel_err(a, b):
    return float(jnp.max(jnp.abs(a - b)) / (jnp.max(jnp.abs(b)) + 1e-6))


if __name__ == "__main__":
    key = jax.random.PRNGKey(0)
    kx1, kg1, kx2, kg2, kp = jax.random.split(key, 5)
    in_ch, n_hid = 48, 32
    params = init_params(kp, in_ch, n_hid)

    # Case 1: N multiple of 128 -> zero-copy G streaming path (no wrapper pad/cast of G),
    # bf16 MXU compute (default).
    N1 = 384
    x1 = jax.random.normal(kx1, (N1, in_ch), jnp.float32)
    G1 = jax.random.normal(kg1, (N1, N1), jnp.float32) * 0.1
    out1, emb1 = hgnn_forward(x1, G1, params, use_bf16=True)
    out1, emb1 = jax.block_until_ready((out1, emb1))
    ref_out1, ref_emb1 = reference_forward(x1, G1, params)
    assert out1.shape == (N1, 2) and emb1.shape == (N1, n_hid)
    assert _max_rel_err(out1, ref_out1) < 5e-2, "bf16 aligned-path out mismatch vs reference"
    assert _max_rel_err(emb1, ref_emb1) < 5e-2, "bf16 aligned-path emb mismatch vs reference"

    # Case 2: ragged N -> minimal-pad path, f32 operands.
    N2 = 300
    x2 = jax.random.normal(kx2, (N2, in_ch), jnp.float32)
    G2 = jax.random.normal(kg2, (N2, N2), jnp.float32) * 0.1
    out2, emb2 = hgnn_forward(x2, G2, params, use_bf16=False)
    out2, emb2 = jax.block_until_ready((out2, emb2))
    ref_out2, ref_emb2 = reference_forward(x2, G2, params)
    assert out2.shape == (N2, 2) and emb2.shape == (N2, n_hid)
    assert _max_rel_err(out2, ref_out2) < 5e-2, "f32 ragged-path out mismatch vs reference"
    assert _max_rel_err(emb2, ref_emb2) < 5e-2, "f32 ragged-path emb mismatch vs reference"

    print("KERNEL_OK")
</pallas_src>

<mosaic_0001>
module attributes {stable_mosaic.version = 11 : i64} {
  func.func @kernel(%arg0: i32, %arg1: memref<192x384xf32, #tpu.memory_space<vmem>>, %arg2: memref<384x128xbf16, #tpu.memory_space<vmem>>, %arg3: memref<128x128xbf16, #tpu.memory_space<vmem>>, %arg4: memref<1x128xf32, #tpu.memory_space<vmem>>, %arg5: memref<128x128xbf16, #tpu.memory_space<vmem>>, %arg6: memref<1x128xf32, #tpu.memory_space<vmem>>, %arg7: memref<192x128xf32, #tpu.memory_space<vmem>>, %arg8: memref<192x128xbf16, #tpu.memory_space<vmem>>) attributes {dimension_semantics = [#tpu.dimension_semantics<parallel>], iteration_bounds = array<i64: 2>, scalar_prefetch = 0 : i64, scratch_operands = 0 : i64, tpu.core_type = #tpu.core_type<tc>, window_params = [{transform_indices = @transform_0, window_bounds = array<i64: 192, 384>}, {pipeline_mode = #tpu.pipeline_mode<synchronous>, transform_indices = @transform_1, window_bounds = array<i64: 384, 128>}, {pipeline_mode = #tpu.pipeline_mode<synchronous>, transform_indices = @transform_2, window_bounds = array<i64: 128, 128>}, {pipeline_mode = #tpu.pipeline_mode<synchronous>, transform_indices = @transform_3, window_bounds = array<i64: 1, 128>}, {pipeline_mode = #tpu.pipeline_mode<synchronous>, transform_indices = @transform_4, window_bounds = array<i64: 128, 128>}, {pipeline_mode = #tpu.pipeline_mode<synchronous>, transform_indices = @transform_5, window_bounds = array<i64: 1, 128>}, {transform_indices = @transform_6, window_bounds = array<i64: 192, 128>}, {transform_indices = @transform_7, window_bounds = array<i64: 192, 128>}]} {
    %c0 = arith.constant 0 : index
    %c0_0 = arith.constant 0 : index
    %0 = vector.load %arg1[%c0, %c0_0] : memref<192x384xf32, #tpu.memory_space<vmem>>, vector<192x384xf32>
    %1 = arith.truncf %0 : vector<192x384xf32> to vector<192x384xbf16>
    %c0_1 = arith.constant 0 : index
    %c0_2 = arith.constant 0 : index
    %2 = vector.load %arg2[%c0_1, %c0_2] : memref<384x128xbf16, #tpu.memory_space<vmem>>, vector<384x128xbf16>
    %cst = arith.constant dense<0.000000e+00> : vector<192x128xf32>
    %3 = tpu.matmul %1, %2, %cst {dimension_numbers = #tpu.dot_dimension_numbers<[1], [0], [0], [1], [0, 0, 1, 1], [], []>} : vector<192x384xbf16>, vector<384x128xbf16>, vector<192x128xf32> -> vector<192x128xf32>
    %cst_3 = arith.constant 0.000000e+00 : f32
    %4 = vector.broadcast %cst_3 : f32 to vector<192x128xf32>
    %5 = arith.maximumf %3, %4 : vector<192x128xf32>
    %6 = arith.truncf %5 : vector<192x128xf32> to vector<192x128xbf16>
    %c0_4 = arith.constant 0 : index
    %c0_5 = arith.constant 0 : index
    %7 = vector.load %arg8[%c0_4, %c0_5] : memref<192x128xbf16, #tpu.memory_space<vmem>>, vector<192x128xbf16>
    tpu.vector_store %arg8[%c0_4, %c0_5], %6 {strides = array<i32>} : memref<192x128xbf16, #tpu.memory_space<vmem>>, vector<192x128xbf16>,
    %8 = arith.truncf %5 : vector<192x128xf32> to vector<192x128xbf16>
    %c0_6 = arith.constant 0 : index
    %c0_7 = arith.constant 0 : index
    %9 = vector.load %arg3[%c0_6, %c0_7] : memref<128x128xbf16, #tpu.memory_space<vmem>>, vector<128x128xbf16>
    %cst_8 = arith.constant dense<0.000000e+00> : vector<192x128xf32>
    %10 = tpu.matmul %8, %9, %cst_8 {dimension_numbers = #tpu.dot_dimension_numbers<[1], [0], [0], [1], [0, 0, 1, 1], [], []>} : vector<192x128xbf16>, vector<128x128xbf16>, vector<192x128xf32> -> vector<192x128xf32>
    %c0_9 = arith.constant 0 : index
    %c0_10 = arith.constant 0 : index
    %11 = vector.load %arg4[%c0_9, %c0_10] : memref<1x128xf32, #tpu.memory_space<vmem>>, vector<1x128xf32>
    %12 = vector.broadcast %11 : vector<1x128xf32> to vector<192x128xf32>
    %13 = arith.addf %10, %12 : vector<192x128xf32>
    %cst_11 = arith.constant 0.000000e+00 : f32
    %14 = vector.broadcast %cst_11 : f32 to vector<192x128xf32>
    %15 = arith.maximumf %13, %14 : vector<192x128xf32>
    %16 = arith.truncf %15 : vector<192x128xf32> to vector<192x128xbf16>
    %c0_12 = arith.constant 0 : index
    %c0_13 = arith.constant 0 : index
    %17 = vector.load %arg5[%c0_12, %c0_13] : memref<128x128xbf16, #tpu.memory_space<vmem>>, vector<128x128xbf16>
    %cst_14 = arith.constant dense<0.000000e+00> : vector<192x128xf32>
    %18 = tpu.matmul %16, %17, %cst_14 {dimension_numbers = #tpu.dot_dimension_numbers<[1], [0], [0], [1], [0, 0, 1, 1], [], []>} : vector<192x128xbf16>, vector<128x128xbf16>, vector<192x128xf32> -> vector<192x128xf32>
    %c0_15 = arith.constant 0 : index
    %c0_16 = arith.constant 0 : index
    %19 = vector.load %arg6[%c0_15, %c0_16] : memref<1x128xf32, #tpu.memory_space<vmem>>, vector<1x128xf32>
    %20 = vector.broadcast %19 : vector<1x128xf32> to vector<192x128xf32>
    %21 = arith.addf %18, %20 : vector<192x128xf32>
    %c0_17 = arith.constant 0 : index
    %c0_18 = arith.constant 0 : index
    %22 = vector.load %arg7[%c0_17, %c0_18] : memref<192x128xf32, #tpu.memory_space<vmem>>, vector<192x128xf32>
    tpu.vector_store %arg7[%c0_17, %c0_18], %21 {strides = array<i32>} : memref<192x128xf32, #tpu.memory_space<vmem>>, vector<192x128xf32>,
    return
  }
  func.func @transform_0(%arg0: i32) -> (i32, i32) {
    %c0_i32 = arith.constant 0 : i32
    %c0_i32_0 = arith.constant 0 : i32
    return %arg0, %c0_i32 : i32, i32
  }
  func.func @transform_1(%arg0: i32) -> (i32, i32) {
    %c0_i32 = arith.constant 0 : i32
    %c0_i32_0 = arith.constant 0 : i32
    %c0_i32_1 = arith.constant 0 : i32
    return %c0_i32, %c0_i32_0 : i32, i32
  }
  func.func @transform_2(%arg0: i32) -> (i32, i32) {
    %c0_i32 = arith.constant 0 : i32
    %c0_i32_0 = arith.constant 0 : i32
    %c0_i32_1 = arith.constant 0 : i32
    return %c0_i32, %c0_i32_0 : i32, i32
  }
  func.func @transform_3(%arg0: i32) -> (i32, i32) {
    %c0_i32 = arith.constant 0 : i32
    %c0_i32_0 = arith.constant 0 : i32
    %c0_i32_1 = arith.constant 0 : i32
    return %c0_i32, %c0_i32_0 : i32, i32
  }
  func.func @transform_4(%arg0: i32) -> (i32, i32) {
    %c0_i32 = arith.constant 0 : i32
    %c0_i32_0 = arith.constant 0 : i32
    %c0_i32_1 = arith.constant 0 : i32
    return %c0_i32, %c0_i32_0 : i32, i32
  }
  func.func @transform_5(%arg0: i32) -> (i32, i32) {
    %c0_i32 = arith.constant 0 : i32
    %c0_i32_0 = arith.constant 0 : i32
    %c0_i32_1 = arith.constant 0 : i32
    return %c0_i32, %c0_i32_0 : i32, i32
  }
  func.func @transform_6(%arg0: i32) -> (i32, i32) {
    %c0_i32 = arith.constant 0 : i32
    %c0_i32_0 = arith.constant 0 : i32
    return %arg0, %c0_i32 : i32, i32
  }
  func.func @transform_7(%arg0: i32) -> (i32, i32) {
    %c0_i32 = arith.constant 0 : i32
    %c0_i32_0 = arith.constant 0 : i32
    return %arg0, %c0_i32 : i32, i32
  }
}

</mosaic_0001>

<bundles_post_ra>
// kernel: tpu_custom_call.1
= control target key start
LH: loop header
LB: loop body
LE: loop exit
PB: predicated region body
PF: predicated region fallthrough
CT: control target
= control target key end

     0   :  { %s3104_s0 = inlined_call_operand.hbm [shape: f32[384,384], index: 0, kind: input, shape index: {}]   ;;  %s3105_s1 = inlined_call_operand.hbm [shape: bf16[384,128], index: 1, kind: input, shape index: {}]   ;;  %s3106_s2 = inlined_call_operand.hbm [shape: bf16[128,128], index: 2, kind: input, shape index: {}]   ;;  %s3107_s3 = inlined_call_operand.vmem [shape: f32[1,128], index: 3, kind: input, shape index: {}]   ;;  %s3108_s4 = inlined_call_operand.hbm [shape: bf16[128,128], index: 4, kind: input, shape index: {}]   ;;  %s3109_s5 = inlined_call_operand.vmem [shape: f32[1,128], index: 5, kind: input, shape index: {}]   ;;  %s3110_s6 = inlined_call_operand.hbm [shape: f32[384,128], index: 6, kind: output, shape index: {0}]   ;;  %s3111_s7 = inlined_call_operand.hbm [shape: bf16[384,128], index: 7, kind: output, shape index: {1}]  }
   0x1   :  { %3115 = sst [smem:[#allocation18_spill]] %s3105_s1 }
   0x2   :  { %13 = vsyncpa [#allocation3], 0 }
   0x3   :  { %15 = vsyncpa [#allocation3 + $0x1], 0 }
   0x4   :  { %16 = vsyncpa [#allocation6], 0 }
   0x5   :  { %17 = vsyncpa [#allocation9], 0 }
   0x6   :  { %18 = vsyncpa [#allocation4], 0 }
   0x7   :  { %20 = vsyncpa [#allocation4 + $0x1], 0 }
   0x8   :  { %21 = vsyncpa [#allocation12], 0 }
   0x9   :  { %23 = vsyncpa [#allocation12 + $0x1], 0  ;;  %s2562_s24 = smov 0   ;;  %s2564_s25 = smov 0  }
   0xa   :  { %s2566_s26 = smov 0   ;;  %s2568_s27 = smov 0  }
   0xb LB: > { %s2583_s28 = sadd.s32 4294967295, %s2506_s27   ;;  %s1688_s29 = sadd.s32 4294967294, %s2506_s27   ;;  %s2506_s27 = sphi %s2568_s27, %s3136_s27   ;;  %s2502_s26 = sphi %s2566_s26, %s3135_s26   ;;  %s2498_s25 = sphi %s2564_s25, %s3134_s25   ;;  %s2494_s24 = sphi %s2562_s24, %s3133_s24  }
   0xc   : > { %p49_p0 = scmp.ne.s32.totalorder %s2498_s25, %s2494_s24  ;;  %p3112_p1 = scmp.eq.s32.totalorder %s2583_s28, 0 }
   0xd   : > { %p184_p3 = scmp.eq.s32.totalorder %s1688_s29, 1  ;;  %p1689_p5 = scmp.ge.s32.totalorder %s2506_s27, 1 }
   0xe   : > { %p2592_p4 = por %p3112_p1, %p49_p0  ;;  %p217_p7 = scmp.lt.s32.totalorder %s2506_s27, 3 }
   0xf   : > { %p2597_p6 = por %p184_p3, %p49_p0  ;;  %s2508_s10 = smov [#allocation5]  }
  0x10   : > { %s3116_s30 = scalar_select %p2592_p4, 1, 0 }
  0x11   : > { %s3117_s8 = scalar_select %p2597_p6, 1, 0 }
  0x12   : > { %p2602_p8 = pnand %p1689_p5, %p217_p7  ;;  %s229_s11 = sshll.u32 %s2508_s10, 4  ;;  %s2606_s11 = int_to_ptr.vmem [resolvable:$true] %s229_s11 }
  0x13   : > { %s2509_s13 = smov [#allocation7]   ;;  %s3120_s1 = sld [smem:[#allocation18_spill]] }
  0x14   : > { %s3118_s9 = scalar_select %p2602_p8, 1, 0 }
  0x15   : > { %p2173_p9 = pneg %p2602_p8  ;;  %s242_s14 = sshll.u32 %s2509_s13, 4  ;;  %s2617_s14 = int_to_ptr.vmem [resolvable:$true] %s242_s14 }
  0x17   : > { %p2613_p11 = pnand %p2173_p9, %p3112_p1 }
  0x19   : > { %s2286_s17 = scalar_lea.hbm %s3120_s1, 3072  ;;  %p2627_p13 = pneg %p2613_p11 }
  0x1a   : > { %p2287_p12 = scmp.ne.s32.totalorder %s3120_s1, %s2286_s17  ;;  %p2293_p5 = scmp.lt.u32.totalorder %s2286_s17, %s3120_s1 }
  0x1c   : > { %p2289_p0 = pnand %p2627_p13, %p2287_p12 }
  0x1e   : > { %p2290_p3 = pneg %p2289_p0 }
  0x20   : > { %p2295_p7 = pnand %p2293_p5, %p2290_p3 }
  0x22   : > { %2298 = shalt.err (!%p2295_p7)
}
  0x23   : > { %s2299_s23 = scalar_lea.vmem %s2606_s11, 3072  ;;  %p2307_p2 = scmp.lt.s32.totalorder %s2606_s11, %s2606_s11 }
  0x24   : > { %p2300_p9 = scmp.ne.s32.totalorder %s2606_s11, %s2299_s23  ;;  %p2308_p6 = scmp.lt.s32.totalorder %s2299_s23, %s2299_s23 }
  0x26   : > { %p2302_p10 = pnand %p2300_p9, %p2627_p13  ;;  %p2309_p12 = por %p2308_p6, %p2307_p2 }
  0x28   : > { %p2303_p1 = pneg %p2302_p10 }
  0x2a   : > { %p2310_p0 = pnand %p2309_p12, %p2303_p1 }
  0x2c   : > { %2313 = shalt.err (!%p2310_p0)
}
  0x2d   : > { %s2510_s29 = smov 64   ;;  %s2511_s10 = smov 4  }
  0x2e   : > { %2176 = dma.hbm_to_vmem [thread:$0]  (!%p2613_p11), %s3120_s1, 3072, %s2606_s11, [#allocation6], %s2510_s29, %s2510_s29, %s2511_s10  }
  0x2f   : > { %s2314_s18 = scalar_lea.hbm %s3106_s2, 1024 }
  0x30   : > { %p2315_p1 = scmp.ne.s32.totalorder %s3106_s2, %s2314_s18  ;;  %p2321_p10 = scmp.lt.u32.totalorder %s2314_s18, %s3106_s2 }
  0x32   : > { %p2317_p2 = pnand %p2315_p1, %p2627_p13 }
  0x34   : > { %p2318_p6 = pneg %p2317_p2 }
  0x36   : > { %p2323_p3 = pnand %p2321_p10, %p2318_p6 }
  0x38   : > { %2326 = shalt.err (!%p2323_p3)
}
  0x39   : > { %s2327_s11 = scalar_lea.vmem %s2617_s14, 1024  ;;  %p2335_p12 = scmp.lt.s32.totalorder %s2617_s14, %s2617_s14 }
  0x3a   : > { %p2328_p5 = scmp.ne.s32.totalorder %s2617_s14, %s2327_s11  ;;  %p2336_p0 = scmp.lt.s32.totalorder %s2327_s11, %s2327_s11 }
  0x3c   : > { %p2330_p7 = pnand %p2328_p5, %p2627_p13  ;;  %p2337_p1 = por %p2336_p0, %p2335_p12 }
  0x3e   : > { %p2331_p9 = pneg %p2330_p7 }
  0x40   : > { %p2338_p2 = pnand %p2337_p1, %p2331_p9 }
  0x42   : > { %2341 = shalt.err (!%p2338_p2)
}
  0x43   : > { %2179 = dma.hbm_to_vmem [thread:$0]  (!%p2613_p11), %s3106_s2, 1024, %s2617_s14, [#allocation6], %s2510_s29, %s2510_s29, %s2511_s10  }
  0x44   : > { %s2512_s16 = smov [#allocation8]   ;;  %s2342_s21 = scalar_lea.hbm %s3108_s4, 1024 }
  0x45   : > { %s258_s17 = sshll.u32 %s2512_s16, 4  ;;  %p2343_p6 = scmp.ne.s32.totalorder %s3108_s4, %s2342_s21  ;;  %s259_s17 = int_to_ptr.vmem [resolvable:$true] %s258_s17 }
  0x46   : > { %p2349_p5 = scmp.lt.u32.totalorder %s2342_s21, %s3108_s4 }
  0x47   : > { %p2345_p10 = pnand %p2343_p6, %p2627_p13 }
  0x49   : > { %p2346_p3 = pneg %p2345_p10 }
  0x4b   : > { %p2351_p7 = pnand %p2349_p5, %p2346_p3 }
  0x4d   : > { %2354 = shalt.err (!%p2351_p7)
}
  0x4e   : > { %s2355_s14 = scalar_lea.vmem %s259_s17, 1024  ;;  %p2363_p1 = scmp.lt.s32.totalorder %s259_s17, %s259_s17 }
  0x4f   : > { %p2356_p9 = scmp.ne.s32.totalorder %s259_s17, %s2355_s14  ;;  %p2364_p2 = scmp.lt.s32.totalorder %s2355_s14, %s2355_s14 }
  0x51   : > { %p2358_p12 = pnand %p2356_p9, %p2627_p13  ;;  %p2365_p4 = por %p2364_p2, %p2363_p1 }
  0x53   : > { %p2359_p0 = pneg %p2358_p12 }
  0x55   : > { %p2366_p8 = pnand %p2365_p4, %p2359_p0 }
  0x57   : > { %2369 = shalt.err (!%p2366_p8)
}
  0x58   : > { %2182 = dma.hbm_to_vmem [thread:$0]  (!%p2613_p11), %s3108_s4, 1024, %s259_s17, [#allocation9], %s2510_s29, %s2510_s29, %s2511_s10  }
  0x59   : > { %s2699_s20 = sadd.s32 1, %s2506_s27   ;;  %s36_s12 = sadd.s32 1, %s2502_s26 }
  0x5a   : > { %s33_s15 = ssub.s32 %s2506_s27, %s2699_s20  ;;  %p43_p4 = scmp.ne.s32.totalorder %s2502_s26, %s2498_s25 }
  0x5b   : > { %p34_p8 = scmp.eq.s32.totalorder %s33_s15, 0  ;;  %p44_p13 = scmp.eq.s32.totalorder %s2506_s27, 0 }
  0x5c   : > { %p3122_p6 = scmp.eq.s32.totalorder %s2583_s28, 1  ;;  %p2197_p3 = scmp.lt.s32.totalorder %s2506_s27, 2 }
  0x5d   : > { %s2715_s18 = scalar_select %p34_p8, %s2502_s26, %s36_s12  }
  0x5e   : > { %p2709_p10 = por %p3122_p6, %p43_p4  ;;  %p45_p5 = por %p44_p13, %p43_p4 }
  0x5f   : > { %s275_s19 = sand.u32 1, %s2502_s26   ;;  %s2198_s29 = smul.u32 9216, %s2506_s27 }
  0x60   : > { %s2150_s21 = smul.u32 576, %s275_s19  ;;  %p2719_p11 = pnand %p2197_p3, %p45_p5 }
  0x61   : > { %s2726_s23 = scalar_lea.hbm %s3104_s0, %s2198_s29  ;;  %s2730_s1 = scalar_lea.sflag [#allocation3], %s275_s19 }
  0x62   : > { %s279_s11 = scalar_lea.vmem [#allocation2], %s2150_s21  ;;  %s2370_s13 = scalar_lea.hbm %s2726_s23, 9216 }
  0x63   : > { %s287_s14 = sshll.u32 %s279_s11, 4  ;;  %p2371_p7 = scmp.ne.s32.totalorder %s2726_s23, %s2370_s13  ;;  %s2728_s14 = int_to_ptr.vmem [resolvable:$true] %s287_s14 }
  0x64   : > { %p2372_p9 = pneg %p2719_p11  ;;  %s2375_s29 = scalar_lea.hbm %s3104_s0, 18432 }
  0x65   : > { %p2376_p1 = scmp.lt.u32.totalorder %s2726_s23, %s3104_s0  ;;  %p2377_p2 = scmp.lt.u32.totalorder %s2375_s29, %s2370_s13 }
  0x66   : > { %p2373_p12 = pnand %p2372_p9, %p2371_p7  ;;  %p2379_p8 = scmp.lt.u32.totalorder %s2370_s13, %s2726_s23 }
  0x67   : > { %p2378_p4 = por %p2377_p2, %p2376_p1 }
  0x68   : > { %p2374_p0 = pneg %p2373_p12 }
  0x69   : > { %p2380_p13 = por %p2379_p8, %p2378_p4 }
  0x6b   : > { %p2381_p6 = pnand %p2380_p13, %p2374_p0 }
  0x6d   : > { %2384 = shalt.err (!%p2381_p6)
}
  0x6e   : > { %s2385_s19 = scalar_lea.vmem %s2728_s14, 9216  ;;  %s2513_s21 = smov [#allocation2]  }
  0x6f   : > { %p2386_p3 = scmp.ne.s32.totalorder %s2728_s14, %s2385_s19  ;;  %s2390_s11 = sshll.u32 %s2513_s21, 4  ;;  %s2391_s11 = int_to_ptr.vmem [resolvable:$false] %s2390_s11 }
  0x70   : > { %s2392_s12 = scalar_lea.vmem %s2391_s11, 18432  ;;  %p2393_p12 = scmp.lt.s32.totalorder %s2728_s14, %s2391_s11 }
  0x71   : > { %p2388_p5 = pnand %p2386_p3, %p2372_p9  ;;  %p2394_p1 = scmp.lt.s32.totalorder %s2392_s12, %s2385_s19 }
  0x73   : > { %p2389_p7 = pneg %p2388_p5  ;;  %p2395_p2 = por %p2394_p1, %p2393_p12 }
  0x75   : > { %p2396_p4 = pnand %p2395_p2, %p2389_p7 }
  0x77   : > { %2399 = shalt.err (!%p2396_p4)
}
  0x78   : > { %s2514_s13 = smov 384   ;;  %s2515_s15 = smov 24  }
  0x79   : > { %2186 = dma.hbm_to_vmem [thread:$0]  (!%p2719_p11), %s2726_s23, 9216, %s2728_s14, %s2730_s1, %s2514_s13, %s2514_s13, %s2515_s15  }
  0x7a   : > { %p3125_p9 = scmp.ne.s32.totalorder %s3118_s9, 0 }
  0x7b   : > { %s2761_s29 = sand.u32 (!%p3125_p9), 1, %s2498_s25   ;;  %p3126_p0 = scmp.ne.s32.totalorder (!%p3125_p9), %s3116_s30, 0 }
  0x7c   : > { %299 = sbr.rel (%p3125_p9) target bundleno = 937 (0x3a9), region = 44  ;;  %s302_s22 = scalar_lea.sflag (!%p3125_p9), [#allocation3], %s2761_s29 }
  0x7d   : > { %s2152_s17 = smul.u32 (!%p3125_p9), 576, %s2761_s29 }
  0x7f   : > { %s2765_s19 = scalar_lea.vmem (!%p3125_p9), [#allocation2], %s2152_s17 }
  0x83   : > { %2473 = dma.done.wait (%p3126_p0), %s302_s22, 9216  }
  0x84   : > { %2475 = vsyncadd (%p3126_p0), %s302_s22, 4294958080  ;;  %p3127_p11 = scmp.eq.s32.totalorder %s2583_s28, 0 }
  0x86   : > { %2477 = dma.done.wait (%p3127_p11), [#allocation6], 4096   ;;  %p3128_p8 = pmov %p3127_p11 }
  0x88   : > { %2479 = vsyncadd (%p3128_p8), [#allocation6], 4294963200  ;;  %p3129_p13 = pmov %p3128_p8 }
  0x89   : > { %p3130_p6 = pmov %p3128_p8 }
  0x8a   : > { %2481 = dma.done.wait (%p3129_p13), [#allocation9], 1024  }
  0x8b   : > { %2483 = vsyncadd (%p3130_p6), [#allocation9], 4294966272  ;;  %v2246_v0 = vld [vmem:[#allocation5 + $0x40] sm:$0xff]   ;;  %v2249_v3 = vld [vmem:[#allocation5 + $0x48] sm:$0xff]   ;;  %s2154_s30 = smul.u32 96, %s2761_s29  ;;  %s1525_s13 = scalar_lea.sflag [#allocation12], %s2761_s29 }
  0x8c   : > { %v2247_v1 = vld [vmem:[#allocation5] sm:$0xff]   ;;  %1866 = vmatprep.subr.bf16.mxu0 %v2246_v0  ;;  %v2250_v4 = vld [vmem:[#allocation5 + $0x8] sm:$0xff]   ;;  %v2252_v6 = vld [vmem:[#allocation5 + $0x50] sm:$0xff]   ;;  %s1794_s14 = smul.u32 1536, %s2583_s28  ;;  %s2516_s17 = smov [#allocation11]  }
  0x8d   : > { %v2248_v2 = vld [vmem:[#allocation5 + $0x80] sm:$0xff]   ;;  %1867 = vmatpush3.bf16.msra.mxu0 %v2247_v1  ;;  %v2251_v5 = vld [vmem:[#allocation5 + $0x88] sm:$0xff]   ;;  %v2253_v7 = vld [vmem:[#allocation5 + $0x10] sm:$0xff]   ;;  %s2877_s9 = scalar_lea.vmem [#allocation11], %s2154_s30  ;;  %s2404_s22 = sshll.u32 %s2516_s17, 4  ;;  %s2405_s22 = int_to_ptr.vmem [resolvable:$false] %s2404_s22 }
  0x8e   : > { %2014 = vmatprep.subr.bf16.mxu1 %v2248_v2  ;;  %1868 = vmatprep.subr.bf16.mxu0 %v2249_v3  ;;  %v2254_v8 = vld [vmem:[#allocation5 + $0x90] sm:$0xff]   ;;  %v2255_v9 = vld [vmem:[#allocation5 + $0x58] sm:$0xff]   ;;  %v2258_v12 = vld [vmem:[#allocation5 + $0x60] sm:$0xff]   ;;  %s2968_s11 = scalar_lea.hbm %s3111_s7, %s1794_s14  ;;  %s1554_s12 = sshll.u32 %s2877_s9, 4  ;;  %s2971_s12 = int_to_ptr.vmem [resolvable:$true] %s1554_s12 }
  0x8f   : > { %2015 = vmatpush3.bf16.msra.mxu1 %v2248_v2  ;;  %v2256_v10 = vld [vmem:[#allocation5 + $0x18] sm:$0xff]   ;;  %v2260_v13 = vld [vmem:[#allocation5 + $0xa0] sm:$0xff]   ;;  %v2261_v15 = vld [vmem:[#allocation5 + $0x68] sm:$0xff]   ;;  %s2400_s15 = scalar_lea.vmem %s2971_s12, 1536  ;;  %p2407_p12 = scmp.lt.s32.totalorder %s2971_s12, %s2405_s22 }
  0x90   : > { %2016 = vmatprep.subr.bf16.mxu1 %v2251_v5  ;;  %v2257_v11 = vld [vmem:[#allocation5 + $0x98] sm:$0xff]   ;;  %v2259_v14 = vld [vmem:[#allocation5 + $0x20] sm:$0xff]   ;;  %v2263_v16 = vld [vmem:[#allocation5 + $0xa8] sm:$0xff]   ;;  %p2401_p3 = scmp.ne.s32.totalorder %s2971_s12, %s2400_s15 }
  0x91   : > { %1869 = vmatpush3.bf16.msra.mxu0 %v2250_v4  ;;  %v2262_v17 = vld [vmem:[#allocation5 + $0x28] sm:$0xff]   ;;  %v2264_v18 = vld [vmem:[#allocation5 + $0x70] sm:$0xff]   ;;  %v2267_v21 = vld [vmem:[#allocation5 + $0x78] sm:$0xff]  }
  0x92   : > { %1870 = vmatprep.subr.bf16.mxu0 %v2252_v6  ;;  %v2266_v19 = vld [vmem:[#allocation5 + $0xb0] sm:$0xff]   ;;  %v358_v22 = vld [vmem:[%s2765_s19 + $0x8] sm:$0xff]  ;;  %v361_v23 = vld [vmem:[%s2765_s19 + $0x20] sm:$0xff]  ;;  %p2402_p5 = pnand %p2401_p3, %p2709_p10 }
  0x93   : > { %2017 = vmatpush3.bf16.msra.mxu1 %v2251_v5  ;;  %v2265_v20 = vld [vmem:[#allocation5 + $0x30] sm:$0xff]   ;;  %v430_v24 = vpack.c.bf16 %v361_v23, %v358_v22  ;;  %v362_v26 = vld [vmem:[%s2765_s19 + $0x28] sm:$0xff]  ;;  %v2269_v27 = vld [vmem:[#allocation5 + $0xb8] sm:$0xff]  }
  0x94   : > { %2018 = vmatprep.subr.bf16.mxu1 %v2254_v8  ;;  %v359_v25 = vld [vmem:[%s2765_s19 + $0x10] sm:$0xff]  ;;  %v2268_v29 = vld [vmem:[#allocation5 + $0x38] sm:$0xff]   ;;  %v357_v30 = vld [vmem:[%s2765_s19] sm:$0xff]  ;;  %p2403_p7 = pneg %p2402_p5 }
  0x95   : > { %1871 = vmatpush3.bf16.msra.mxu0 %v2253_v7  ;;  %v431_v28 = vpack.c.bf16 %v362_v26, %v359_v25  ;;  %689 = vmatprep.mubr.bf16.mxu0 %v430_v24  ;;  %v360_v31 = vld [vmem:[%s2765_s19 + $0x18] sm:$0xff]  ;;  %v367_v33 = vld [vmem:[%s2765_s19 + $0x50] sm:$0xff]  ;;  %v365_v34 = vld [vmem:[%s2765_s19 + $0x40] sm:$0xff] }
  0x96   : > { %1872 = vmatprep.subr.bf16.mxu0 %v2255_v9  ;;  %v364_v32 = vld [vmem:[%s2765_s19 + $0x38] sm:$0xff]  ;;  %v429_v36 = vpack.c.bf16 %v360_v31, %v357_v30  ;;  %v371_v37 = vld [vmem:[%s2765_s19 + $0x70] sm:$0xff]  ;;  %v374_v38 = vld [vmem:[%s2765_s19 + $0x88] sm:$0xff] }
  0x97   : > { %2019 = vmatpush3.bf16.msra.mxu1 %v2254_v8  ;;  %2030 = vmatprep.mubr.bf16.mxu1 %v431_v28  ;;  %v368_v35 = vld [vmem:[%s2765_s19 + $0x58] sm:$0xff]  ;;  %v433_v39 = vpack.c.bf16 %v367_v33, %v364_v32  ;;  %v437_v41 = vpack.c.bf16 %v374_v38, %v371_v37  ;;  %v363_v42 = vld [vmem:[%s2765_s19 + $0x30] sm:$0xff]  ;;  %v366_v43 = vld [vmem:[%s2765_s19 + $0x48] sm:$0xff] }
  0x98   : > { %2020 = vmatprep.subr.bf16.mxu1 %v2257_v11  ;;  %v434_v40 = vpack.c.bf16 %v368_v35, %v365_v34  ;;  %v370_v44 = vld [vmem:[%s2765_s19 + $0x68] sm:$0xff]  ;;  %v373_v45 = vld [vmem:[%s2765_s19 + $0x80] sm:$0xff]  ;;  %v380_v47 = vld [vmem:[%s2765_s19 + $0xb8] sm:$0xff]  ;;  %v432_v48 = vpack.c.bf16 %v366_v43, %v363_v42 }
  0x99   : > { %1873 = vmatpush3.bf16.msra.mxu0 %v2256_v10  ;;  %v377_v46 = vld [vmem:[%s2765_s19 + $0xa0] sm:$0xff]  ;;  %v383_v49 = vld [vmem:[%s2765_s19 + $0xd0] sm:$0xff]  ;;  %v386_v50 = vld [vmem:[%s2765_s19 + $0xe8] sm:$0xff]  ;;  %v436_v51 = vpack.c.bf16 %v373_v45, %v370_v44 }
  0x9a   : > { %1874 = vmatprep.subr.bf16.mxu0 %v2258_v12  ;;  %v440_v52 = vpack.c.bf16 %v380_v47, %v377_v46  ;;  %v443_v53 = vpack.c.bf16 %v386_v50, %v383_v49  ;;  %v369_v54 = vld [vmem:[%s2765_s19 + $0x60] sm:$0xff]  ;;  %v372_v55 = vld [vmem:[%s2765_s19 + $0x78] sm:$0xff]  ;;  %v379_v57 = vld [vmem:[%s2765_s19 + $0xb0] sm:$0xff] }
  0x9b   : > { %2021 = vmatpush3.bf16.msra.mxu1 %v2257_v11  ;;  %v376_v56 = vld [vmem:[%s2765_s19 + $0x98] sm:$0xff]  ;;  %v389_v58 = vld [vmem:[%s2765_s19 + $0x100] sm:$0xff]  ;;  %v435_v60 = vpack.c.bf16 %v372_v55, %v369_v54  ;;  %v395_v61 = vld [vmem:[%s2765_s19 + $0x130] sm:$0xff] }
  0x9c   : > { %2022 = vmatprep.subr.bf16.mxu1 %v2260_v13  ;;  %v392_v59 = vld [vmem:[%s2765_s19 + $0x118] sm:$0xff]  ;;  %v398_v62 = vld [vmem:[%s2765_s19 + $0x148] sm:$0xff]  ;;  %v439_v63 = vpack.c.bf16 %v379_v57, %v376_v56  ;;  %v2270_v1 = vld [vmem:[#allocation7] sm:$0xff]  }
  0x9d   : > { %1875 = vmatpush3.bf16.msra.mxu0 %v2259_v14  ;;  %v446_v0 = vpack.c.bf16 %v392_v59, %v389_v58  ;;  %v375_v2 = vld [vmem:[%s2765_s19 + $0x90] sm:$0xff]  ;;  %v378_v3 = vld [vmem:[%s2765_s19 + $0xa8] sm:$0xff]  ;;  %v449_v4 = vpack.c.bf16 %v398_v62, %v395_v61  ;;  %v385_v7 = vld [vmem:[%s2765_s19 + $0xe0] sm:$0xff] }
  0x9e   : > { %1876 = vmatprep.subr.bf16.mxu0 %v2261_v15  ;;  %v2271_v5 = vld [vmem:[#allocation7 + $0x8] sm:$0xff]   ;;  %v2272_v8 = vld [vmem:[#allocation7 + $0x10] sm:$0xff]   ;;  %v401_v9 = vld [vmem:[%s2765_s19 + $0x160] sm:$0xff] }
  0x9f   : > { %2023 = vmatpush3.bf16.msra.mxu1 %v2260_v13  ;;  %v382_v6 = vld [vmem:[%s2765_s19 + $0xc8] sm:$0xff]  ;;  %v404_v10 = vld [vmem:[%s2765_s19 + $0x178] sm:$0xff]  ;;  %v407_v11 = vld [vmem:[%s2765_s19 + $0x190] sm:$0xff]  ;;  %v438_v13 = vpack.c.bf16 %v378_v3, %v375_v2 }
  0xa0   : > { %2024 = vmatprep.subr.bf16.mxu1 %v2263_v16  ;;  %v410_v12 = vld [vmem:[%s2765_s19 + $0x1a8] sm:$0xff]  ;;  %v442_v14 = vpack.c.bf16 %v385_v7, %v382_v6  ;;  %v452_v15 = vpack.c.bf16 %v404_v10, %v401_v9  ;;  %v416_v22 = vld [vmem:[%s2765_s19 + $0x1d8] sm:$0xff]  ;;  %v419_v24 = vld [vmem:[%s2765_s19 + $0x1f0] sm:$0xff] }
  0xa1   : > { %1877 = vmatpush3.bf16.msra.mxu0 %v2262_v17  ;;  %v455_v17 = vpack.c.bf16 %v410_v12, %v407_v11  ;;  %v422_v25 = vld [vmem:[%s2765_s19 + $0x208] sm:$0xff]  ;;  %v397_v32 = vld [vmem:[%s2765_s19 + $0x140] sm:$0xff]  ;;  %v428_v34 = vld [vmem:[%s2765_s19 + $0x238] sm:$0xff] }
  0xa2   : > { %1878 = vmatprep.subr.bf16.mxu0 %v2264_v18  ;;  %v384_v18 = vld [vmem:[%s2765_s19 + $0xd8] sm:$0xff]  ;;  %v461_v28 = vpack.c.bf16 %v422_v25, %v419_v24  ;;  %v390_v30 = vld [vmem:[%s2765_s19 + $0x108] sm:$0xff]  ;;  %v425_v33 = vld [vmem:[%s2765_s19 + $0x220] sm:$0xff] }
  0xa3   : > { %2025 = vmatpush3.bf16.msra.mxu1 %v2263_v16  ;;  %v381_v16 = vld [vmem:[%s2765_s19 + $0xc0] sm:$0xff]  ;;  %v394_v31 = vld [vmem:[%s2765_s19 + $0x128] sm:$0xff]  ;;  %v464_v37 = vpack.c.bf16 %v428_v34, %v425_v33  ;;  %v399_v44 = vld [vmem:[%s2765_s19 + $0x150] sm:$0xff] }
  0xa4   : > { %2026 = vmatprep.subr.bf16.mxu1 %v2266_v19  ;;  %v441_v23 = vpack.c.bf16 %v384_v18, %v381_v16  ;;  %v393_v38 = vld [vmem:[%s2765_s19 + $0x120] sm:$0xff]  ;;  %v402_v45 = vld [vmem:[%s2765_s19 + $0x168] sm:$0xff]  ;;  %v411_v56 = vld [vmem:[%s2765_s19 + $0x1b0] sm:$0xff] }
  0xa5   : > { %1879 = vmatpush3.bf16.msra.mxu0 %v2265_v20  ;;  %v391_v20 = vld [vmem:[%s2765_s19 + $0x110] sm:$0xff]  ;;  %v406_v46 = vld [vmem:[%s2765_s19 + $0x188] sm:$0xff]  ;;  %v409_v47 = vld [vmem:[%s2765_s19 + $0x1a0] sm:$0xff] }
  0xa6   : > { %1880 = vmatprep.subr.bf16.mxu0 %v2267_v21  ;;  %v413_v21 = vld [vmem:[%s2765_s19 + $0x1c0] sm:$0xff]  ;;  %v454_v49 = vpack.c.bf16 %v409_v47, %v406_v46  ;;  %v414_v57 = vld [vmem:[%s2765_s19 + $0x1c8] sm:$0xff]  ;;  %v2273_v6 = vld [vmem:[#allocation7 + $0x18] sm:$0xff]  }
  0xa7   : > { %2027 = vmatpush3.bf16.msra.mxu1 %v2266_v19  ;;  %v388_v19 = vld [vmem:[%s2765_s19 + $0xf8] sm:$0xff]  ;;  %v405_v50 = vld [vmem:[%s2765_s19 + $0x180] sm:$0xff]  ;;  %v418_v58 = vld [vmem:[%s2765_s19 + $0x1e8] sm:$0xff] }
  0xa8   : > { %2028 = vmatprep.subr.bf16.mxu1 %v2269_v27  ;;  %v445_v26 = vpack.c.bf16 %v391_v20, %v388_v19  ;;  %v421_v59 = vld [vmem:[%s2765_s19 + $0x200] sm:$0xff]  ;;  %v2275_v9 = vld [vmem:[#allocation7 + $0x28] sm:$0xff]   ;;  %v2276_v10 = vld [vmem:[#allocation7 + $0x30] sm:$0xff]  }
  0xa9   : > { %1881 = vmatpush3.bf16.msra.mxu0 %v2268_v29  ;;  %v387_v29 = vld [vmem:[%s2765_s19 + $0xf0] sm:$0xff]  ;;  %v460_v61 = vpack.c.bf16 %v421_v59, %v418_v58  ;;  %v417_v62 = vld [vmem:[%s2765_s19 + $0x1e0] sm:$0xff]  ;;  %v2277_v11 = vld [vmem:[#allocation7 + $0x38] sm:$0xff]  }
  0xaa   : > { %v444_v35 = vpack.c.bf16 %v390_v30, %v387_v29  ;;  %v2851_v12 = vld [vmem:[#allocation8] sm:$0xff]  }
  0xab   : > { %2029 = vmatpush3.bf16.msra.mxu1 %v2269_v27  ;;  %v458_v27 = vpack.c.bf16 %v416_v22, %v413_v21  ;;  %2094 = vmatprep.subr.bf16.mxu0 %v2851_v12  ;;  %v2867_v16 = vld [vmem:[#allocation8 + $0x20] sm:$0xff]  }
  0xac   : > { %690 = vmatmul.mubr.bf16.vlgmr.msra.gmra.mrb[0].mxu0 %v429_v36  ;;  %2054 = vmatprep.subr.bf16.mxu1 %v2270_v1  ;;  %v448_v36 = vpack.c.bf16 %v397_v32, %v394_v31 }
  0xad   : > { %697 = vmatprep.mubr.bf16.mxu0 %v433_v39  ;;  %v396_v39 = vld [vmem:[%s2765_s19 + $0x138] sm:$0xff]  ;;  %2095 = vmatpush3.bf16.msra.mxu0 %v2851_v12 }
  0xae   : > { %2031 = vmatmul.mubr.bf16.vlgmr.msra.gmra.mrb[0].mxu1 %v434_v40  ;;  %v400_v40 = vld [vmem:[%s2765_s19 + $0x158] sm:$0xff]  ;;  %v447_v42 = vpack.c.bf16 %v396_v39, %v393_v38 }
  0xaf   : > { %2034 = vmatprep.mubr.bf16.mxu1 %v437_v41  ;;  %2055 = vmatpush3.bf16.msra.mxu1 %v2270_v1  ;;  %v403_v41 = vld [vmem:[%s2765_s19 + $0x170] sm:$0xff] }
  0xb0   : > { %2056 = vmatprep.subr.bf16.mxu1 %v2271_v5  ;;  %v451_v43 = vpack.c.bf16 %v403_v41, %v400_v40  ;;  %v427_v1 = vld [vmem:[%s2765_s19 + $0x230] sm:$0xff] }
  0xb3   : > { %2057 = vmatpush3.bf16.msra.mxu1 %v2271_v5  ;;  %v426_v5 = vld [vmem:[%s2765_s19 + $0x228] sm:$0xff] }
  0xb4   : > { %698 = vmatmul.mubr.bf16.gmra.mrb[4].mxu0 %v432_v48  ;;  %2058 = vmatprep.subr.bf16.mxu1 %v2272_v8  ;;  %v450_v48 = vpack.c.bf16 %v402_v45, %v399_v44 }
  0xb5   : > { %705 = vmatprep.mubr.bf16.mxu0 %v436_v51  ;;  %v408_v51 = vld [vmem:[%s2765_s19 + $0x198] sm:$0xff] }
  0xb6   : > { %2035 = vmatmul.mubr.bf16.gmra.mrb[4].mxu1 %v440_v52  ;;  %v412_v52 = vld [vmem:[%s2765_s19 + $0x1b8] sm:$0xff]  ;;  %v453_v54 = vpack.c.bf16 %v408_v51, %v405_v50 }
  0xb7   : > { %2038 = vmatprep.mubr.bf16.mxu1 %v443_v53  ;;  %2059 = vmatpush3.bf16.msra.mxu1 %v2272_v8  ;;  %v415_v53 = vld [vmem:[%s2765_s19 + $0x1d0] sm:$0xff]  ;;  %v2274_v8 = vld [vmem:[#allocation7 + $0x20] sm:$0xff]  }
  0xb8   : > { %v457_v55 = vpack.c.bf16 %v415_v53, %v412_v52  ;;  %2060 = vmatprep.subr.bf16.mxu1 %v2273_v6 }
  0xbb   : > { %2061 = vmatpush3.bf16.msra.mxu1 %v2273_v6 }
  0xbc   : > { %706 = vmatmul.mubr.bf16.gmra.mrb[8].mxu0 %v435_v60  ;;  %v456_v60 = vpack.c.bf16 %v414_v57, %v411_v56  ;;  %2062 = vmatprep.subr.bf16.mxu1 %v2274_v8 }
  0xbd   : > { %713 = vmatprep.mubr.bf16.mxu0 %v439_v63  ;;  %v420_v63 = vld [vmem:[%s2765_s19 + $0x1f8] sm:$0xff] }
  0xbe   : > { %2039 = vmatmul.mubr.bf16.gmra.mrb[8].mxu1 %v446_v0  ;;  %v424_v0 = vld [vmem:[%s2765_s19 + $0x218] sm:$0xff]  ;;  %v459_v2 = vpack.c.bf16 %v420_v63, %v417_v62 }
  0xbf   : > { %2042 = vmatprep.mubr.bf16.mxu1 %v449_v4  ;;  %v463_v3 = vpack.c.bf16 %v427_v1, %v424_v0  ;;  %v423_v4 = vld [vmem:[%s2765_s19 + $0x210] sm:$0xff]  ;;  %2063 = vmatpush3.bf16.msra.mxu1 %v2274_v8  ;;  %s2406_s19 = scalar_lea.vmem %s2405_s22, 3072 }
  0xc0   : > { %v462_v7 = vpack.c.bf16 %v426_v5, %v423_v4  ;;  %2064 = vmatprep.subr.bf16.mxu1 %v2275_v9  ;;  %p2408_p1 = scmp.lt.s32.totalorder %s2406_s19, %s2400_s15 }
  0xc2   : > { %p2409_p2 = por %p2408_p1, %p2407_p12 }
  0xc3   : > { %2065 = vmatpush3.bf16.msra.mxu1 %v2275_v9 }
  0xc4   : > { %714 = vmatmul.mubr.bf16.gmra.mrb[12].mxu0 %v438_v13  ;;  %2066 = vmatprep.subr.bf16.mxu1 %v2276_v10  ;;  %v2853_v13 = vld [vmem:[#allocation8 + $0x8] sm:$0xff]   ;;  %p2410_p4 = pnand %p2409_p2, %p2403_p7 }
  0xc5   : > { %721 = vmatprep.mubr.bf16.mxu0 %v442_v14  ;;  %2096 = vmatprep.subr.bf16.mxu0 %v2853_v13  ;;  %v2859_v14 = vld [vmem:[#allocation8 + $0x10] sm:$0xff]  }
  0xc6   : > { %2043 = vmatmul.mubr.bf16.gmra.mrb[12].mxu1 %v452_v15  ;;  %2097 = vmatpush3.bf16.msra.mxu0 %v2853_v13  ;;  %v2863_v15 = vld [vmem:[#allocation8 + $0x18] sm:$0xff]  }
  0xc7   : > { %2046 = vmatprep.mubr.bf16.mxu1 %v455_v17  ;;  %2067 = vmatpush3.bf16.msra.mxu1 %v2276_v10  ;;  %v2871_v17 = vld [vmem:[#allocation8 + $0x28] sm:$0xff]  }
  0xc8   : > { %2068 = vmatprep.subr.bf16.mxu1 %v2277_v11  ;;  %2098 = vmatprep.subr.bf16.mxu0 %v2859_v14 }
  0xca   : > { %2099 = vmatpush3.bf16.msra.mxu0 %v2859_v14 }
  0xcb   : > { %2069 = vmatpush3.bf16.msra.mxu1 %v2277_v11  ;;  %2100 = vmatprep.subr.bf16.mxu0 %v2863_v15 }
  0xcc   : > { %722 = vmatmul.mubr.bf16.gmra.mrb[16].mxu0 %v441_v23  ;;  %2134 = vmatprep.subr.bf16.mxu1 %v2851_v12 }
  0xcd   : > { %729 = vmatprep.mubr.bf16.mxu0 %v445_v26 }
  0xce   : > { %2047 = vmatmul.mubr.bf16.gmra.mrb[16].mxu1 %v458_v27  ;;  %2101 = vmatpush3.bf16.msra.mxu0 %v2863_v15 }
  0xcf   : > { %2050 = vmatprep.mubr.bf16.mxu1 %v461_v28  ;;  %2102 = vmatprep.subr.bf16.mxu0 %v2867_v16 }
  0xd2   : > { %2103 = vmatpush3.bf16.msra.mxu0 %v2867_v16 }
  0xd3   : > { %2104 = vmatprep.subr.bf16.mxu0 %v2871_v17 }
  0xd4   : > { %730 = vmatmul.mubr.bf16.gmra.mrb[20].mxu0 %v444_v35 }
  0xd5   : > { %737 = vmatprep.mubr.bf16.mxu0 %v448_v36 }
  0xd6   : > { %2051 = vmatmul.mubr.bf16.gmra.mrb[20].mxu1 %v464_v37  ;;  %2105 = vmatpush3.bf16.msra.mxu0 %v2871_v17 }
  0xdc   : > { %738 = vmatmul.mubr.bf16.gmra.mrb[24].mxu0 %v447_v42 }
  0xdd   : > { %745 = vmatprep.mubr.bf16.mxu0 %v451_v43 }
  0xe4   : > { %746 = vmatmul.mubr.bf16.gmra.mrb[28].mxu0 %v450_v48 }
  0xe5   : > { %753 = vmatprep.mubr.bf16.mxu0 %v454_v49 }
  0xec   : > { %754 = vmatmul.mubr.bf16.gmra.mrb[32].mxu0 %v453_v54 }
  0xed   : > { %761 = vmatprep.mubr.bf16.mxu0 %v457_v55 }
  0xf4   : > { %762 = vmatmul.mubr.bf16.gmra.mrb[36].mxu0 %v456_v60 }
  0xf5   : > { %769 = vmatprep.mubr.bf16.mxu0 %v460_v61 }
  0xfc   : > { %770 = vmatmul.mubr.bf16.gmra.mrb[40].mxu0 %v459_v2 }
  0xfd   : > { %777 = vmatprep.mubr.bf16.mxu0 %v463_v3 }
 0x104   : > { %778 = vmatmul.mubr.bf16.gmra.mrb[44].mxu0 %v462_v7 }
 0x17f   : > { %v1882_v18 = vpop.f32.mrb[0].mxu0 }
 0x180   : > { %v1883_v19 = vpop.f32.mrb[1].mxu0 }
 0x181   : > { %v1884_v20 = vadd.f32 %v1883_v19, %v1882_v18  ;;  %v1885_v21 = vpop.f32.mrb[2].mxu0  ;;  %v2032_v22 = vpop.f32.mrb[0].mxu1 }
 0x182   : > { %v1886_v23 = vpop.f32.mrb[3].mxu0  ;;  %v820_v24 = vpop.f32.mrb[1].mxu1 }
 0x183   : > { %v1887_v25 = vadd.f32 %v1886_v23, %v1885_v21  ;;  %v821_v26 = vadd.f32 %v1884_v20, %v820_v24  ;;  %v2033_v27 = vpop.f32.mrb[2].mxu1 }
 0x184   : > { %v823_v28 = vpop.f32.mrb[3].mxu1 }
 0x185   : > { %v824_v29 = vadd.f32 %v1887_v25, %v823_v28  ;;  %v915_v30 = vmax.f32 %v821_v26, 0.0 }
 0x187   : > { %v916_v31 = vmax.f32 %v824_v29, 0.0  ;;  %v1888_v32 = vpop.f32.mrb[4].mxu0 }
 0x188   : > { %v1889_v33 = vpop.f32.mrb[5].mxu0 }
 0x189   : > { %v939_v34 = vpack.c.bf16 %v916_v31, %v915_v30  ;;  %v1890_v35 = vadd.f32 %v1889_v33, %v1888_v32  ;;  %v1891_v36 = vpop.f32.mrb[6].mxu0  ;;  %v2036_v37 = vpop.f32.mrb[4].mxu1 }
 0x18a   : > { %v1892_v38 = vpop.f32.mrb[7].mxu0  ;;  %v836_v39 = vpop.f32.mrb[5].mxu1 }
 0x18b   : > { %1799 = vst [vmem:[%s2877_s9] sm:$0xff] %v939_v34   ;;  %v829_v40 = vadd.f32 %v2032_v22, %v1890_v35  ;;  %v1893_v41 = vadd.f32 %v1892_v38, %v1891_v36  ;;  %2070 = vmatprep.mubr.bf16.mxu1 %v939_v34  ;;  %v2037_v42 = vpop.f32.mrb[6].mxu1 }
 0x18c   : > { %v839_v43 = vpop.f32.mrb[7].mxu1 }
 0x18d   : > { %v832_v44 = vadd.f32 %v2033_v27, %v1893_v41  ;;  %v917_v45 = vmax.f32 %v829_v40, 0.0 }
 0x18f   : > { %v918_v46 = vmax.f32 %v832_v44, 0.0  ;;  %v1894_v47 = vpop.f32.mrb[8].mxu0 }
 0x190   : > { %v1895_v48 = vpop.f32.mrb[9].mxu0 }
 0x191   : > { %v940_v49 = vpack.c.bf16 %v918_v46, %v917_v45  ;;  %v1896_v50 = vadd.f32 %v1895_v48, %v1894_v47  ;;  %v1897_v51 = vpop.f32.mrb[10].mxu0  ;;  %v2880_v52 = vpop.f32.mrb[8].mxu1 }
 0x192   : > { %v1898_v53 = vpop.f32.mrb[11].mxu0  ;;  %v852_v54 = vpop.f32.mrb[9].mxu1 }
 0x193   : > { %1855 = vst [vmem:[%s2877_s9 + $0x8] sm:$0xff] %v940_v49   ;;  %v1899_v55 = vadd.f32 %v1898_v53, %v1897_v51  ;;  %v837_v56 = vadd.f32 %v1896_v50, %v836_v39  ;;  %2071 = vmatmul.mubr.bf16.vlgmr.msra.gmra.mrb[24].mxu1 %v940_v49  ;;  %v2883_v57 = vpop.f32.mrb[10].mxu1 }
 0x194   : > { %v855_v58 = vpop.f32.mrb[11].mxu1  ;;  %2142 = vmatpush3.bf16.msra.mxu1 %v2851_v12 }
 0x195   : > { %v840_v59 = vadd.f32 %v1899_v55, %v839_v43  ;;  %2135 = vmatprep.subr.bf16.mxu1 %v2853_v13  ;;  %v919_v60 = vmax.f32 %v837_v56, 0.0 }
 0x197   : > { %v920_v61 = vmax.f32 %v840_v59, 0.0  ;;  %v1900_v62 = vpop.f32.mrb[12].mxu0 }
 0x198   : > { %v1901_v63 = vpop.f32.mrb[13].mxu0  ;;  %2143 = vmatpush3.bf16.msra.mxu1 %v2853_v13 }
 0x199   : > { %v941_v0 = vpack.c.bf16 %v920_v61, %v919_v60  ;;  %v1902_v1 = vadd.f32 %v1901_v63, %v1900_v62  ;;  %v1903_v2 = vpop.f32.mrb[14].mxu0  ;;  %v2888_v3 = vpop.f32.mrb[12].mxu1  ;;  %2136 = vmatprep.subr.bf16.mxu1 %v2859_v14 }
 0x19a   : > { %v1904_v4 = vpop.f32.mrb[15].mxu0  ;;  %v868_v5 = vpop.f32.mrb[13].mxu1 }
 0x19b   : > { %1856 = vst [vmem:[%s2877_s9 + $0x10] sm:$0xff] %v941_v0   ;;  %v845_v6 = vadd.f32 %v2036_v37, %v1902_v1  ;;  %v1905_v7 = vadd.f32 %v1904_v4, %v1903_v2  ;;  %2074 = vmatprep.mubr.bf16.mxu1 %v941_v0  ;;  %v2892_v8 = vpop.f32.mrb[14].mxu1 }
 0x19c   : > { %v871_v9 = vpop.f32.mrb[15].mxu1  ;;  %2144 = vmatpush3.bf16.msra.mxu1 %v2859_v14 }
 0x19d   : > { %v848_v10 = vadd.f32 %v2037_v42, %v1905_v7  ;;  %2137 = vmatprep.subr.bf16.mxu1 %v2863_v15  ;;  %v921_v11 = vmax.f32 %v845_v6, 0.0 }
 0x19f   : > { %v922_v12 = vmax.f32 %v848_v10, 0.0  ;;  %v1906_v13 = vpop.f32.mrb[16].mxu0 }
 0x1a0   : > { %v1907_v18 = vpop.f32.mrb[17].mxu0  ;;  %2145 = vmatpush3.bf16.msra.mxu1 %v2863_v15 }
 0x1a1   : > { %v1908_v19 = vadd.f32 %v1907_v18, %v1906_v13  ;;  %v1909_v20 = vpop.f32.mrb[18].mxu0  ;;  %v942_v21 = vpack.c.bf16 %v922_v12, %v921_v11  ;;  %v2897_v22 = vpop.f32.mrb[16].mxu1  ;;  %2138 = vmatprep.subr.bf16.mxu1 %v2867_v16 }
 0x1a2   : > { %v1910_v23 = vpop.f32.mrb[19].mxu0  ;;  %v2900_v24 = vpop.f32.mrb[17].mxu1 }
 0x1a3   : > { %v1911_v14 = vadd.f32 %v1910_v23, %v1909_v20  ;;  %v853_v25 = vadd.f32 %v1908_v19, %v852_v54  ;;  %1857 = vst [vmem:[%s2877_s9 + $0x18] sm:$0xff] %v942_v21   ;;  %2075 = vmatmul.mubr.bf16.gmra.mrb[28].mxu1 %v942_v21  ;;  %v2903_v26 = vpop.f32.mrb[18].mxu1 }
 0x1a4   : > { %v887_v27 = vpop.f32.mrb[19].mxu1  ;;  %2146 = vmatpush3.bf16.msra.mxu1 %v2867_v16 }
 0x1a5   : > { %v856_v15 = vadd.f32 %v1911_v14, %v855_v58  ;;  %2139 = vmatprep.subr.bf16.mxu1 %v2871_v17  ;;  %v923_v28 = vmax.f32 %v853_v25, 0.0 }
 0x1a7   : > { %v924_v29 = vmax.f32 %v856_v15, 0.0  ;;  %v1912_v30 = vpop.f32.mrb[20].mxu0 }
 0x1a8   : > { %v1913_v31 = vpop.f32.mrb[21].mxu0  ;;  %2147 = vmatpush3.bf16.msra.mxu1 %v2871_v17 }
 0x1a9   : > { %v943_v32 = vpack.c.bf16 %v924_v29, %v923_v28  ;;  %v1914_v33 = vadd.f32 %v1913_v31, %v1912_v30  ;;  %v1915_v34 = vpop.f32.mrb[22].mxu0  ;;  %v2908_v35 = vpop.f32.mrb[20].mxu1 }
 0x1aa   : > { %v1916_v36 = vpop.f32.mrb[23].mxu0  ;;  %v2910_v37 = vpop.f32.mrb[21].mxu1 }
 0x1ab   : > { %1858 = vst [vmem:[%s2877_s9 + $0x20] sm:$0xff] %v943_v32   ;;  %v861_v16 = vadd.f32 %v2880_v52, %v1914_v33  ;;  %v1917_v38 = vadd.f32 %v1916_v36, %v1915_v34  ;;  %2078 = vmatprep.mubr.bf16.mxu1 %v943_v32  ;;  %v2914_v39 = vpop.f32.mrb[22].mxu1 }
 0x1ac   : > { %v2916_v40 = vpop.f32.mrb[23].mxu1 }
 0x1ad   : > { %v864_v17 = vadd.f32 %v2883_v57, %v1917_v38  ;;  %v925_v41 = vmax.f32 %v861_v16, 0.0 }
 0x1af   : > { %v926_v42 = vmax.f32 %v864_v17, 0.0  ;;  %v1918_v43 = vpop.f32.mrb[24].mxu0 }
 0x1b0   : > { %v1919_v44 = vpop.f32.mrb[25].mxu0 }
 0x1b1   : > { %v1920_v45 = vadd.f32 %v1919_v44, %v1918_v43  ;;  %v1921_v46 = vpop.f32.mrb[26].mxu0  ;;  %v944_v47 = vpack.c.bf16 %v926_v42, %v925_v41 }
 0x1b2   : > { %v1922_v48 = vpop.f32.mrb[27].mxu0 }
 0x1b3   : > { %v1923_v49 = vadd.f32 %v1922_v48, %v1921_v46  ;;  %v869_v50 = vadd.f32 %v1920_v45, %v868_v5  ;;  %1859 = vst [vmem:[%s2877_s9 + $0x28] sm:$0xff] %v944_v47   ;;  %2079 = vmatmul.mubr.bf16.gmra.mrb[32].mxu1 %v944_v47 }
 0x1b5   : > { %v872_v51 = vadd.f32 %v1923_v49, %v871_v9  ;;  %v927_v52 = vmax.f32 %v869_v50, 0.0  ;;  %v2285_v49 = vld [vmem:[#allocation8 + $0x38] sm:$0xff]  }
 0x1b7   : > { %v928_v53 = vmax.f32 %v872_v51, 0.0  ;;  %v1924_v54 = vpop.f32.mrb[28].mxu0 }
 0x1b8   : > { %v1925_v55 = vpop.f32.mrb[29].mxu0 }
 0x1b9   : > { %v945_v56 = vpack.c.bf16 %v928_v53, %v927_v52  ;;  %v1926_v57 = vadd.f32 %v1925_v55, %v1924_v54  ;;  %v1927_v58 = vpop.f32.mrb[30].mxu0 }
 0x1ba   : > { %v1928_v59 = vpop.f32.mrb[31].mxu0 }
 0x1bb   : > { %1860 = vst [vmem:[%s2877_s9 + $0x30] sm:$0xff] %v945_v56   ;;  %v877_v60 = vadd.f32 %v2888_v3, %v1926_v57  ;;  %v1929_v61 = vadd.f32 %v1928_v59, %v1927_v58  ;;  %2082 = vmatprep.mubr.bf16.mxu1 %v945_v56 }
 0x1bd   : > { %v880_v62 = vadd.f32 %v2892_v8, %v1929_v61  ;;  %v929_v63 = vmax.f32 %v877_v60, 0.0 }
 0x1bf   : > { %v930_v0 = vmax.f32 %v880_v62, 0.0  ;;  %v1930_v1 = vpop.f32.mrb[32].mxu0 }
 0x1c0   : > { %v1931_v2 = vpop.f32.mrb[33].mxu0 }
 0x1c1   : > { %v1932_v4 = vadd.f32 %v1931_v2, %v1930_v1  ;;  %v1933_v5 = vpop.f32.mrb[34].mxu0  ;;  %v946_v6 = vpack.c.bf16 %v930_v0, %v929_v63 }
 0x1c2   : > { %v1934_v7 = vpop.f32.mrb[35].mxu0 }
 0x1c3   : > { %v1935_v9 = vadd.f32 %v1934_v7, %v1933_v5  ;;  %v885_v10 = vadd.f32 %v1932_v4, %v2900_v24  ;;  %1861 = vst [vmem:[%s2877_s9 + $0x38] sm:$0xff] %v946_v6   ;;  %2083 = vmatmul.mubr.bf16.gmra.mrb[36].mxu1 %v946_v6 }
 0x1c5   : > { %v888_v11 = vadd.f32 %v1935_v9, %v887_v27  ;;  %v931_v3 = vmax.f32 %v885_v10, 0.0 }
 0x1c7   : > { %v932_v12 = vmax.f32 %v888_v11, 0.0  ;;  %v1936_v13 = vpop.f32.mrb[36].mxu0 }
 0x1c8   : > { %v1937_v18 = vpop.f32.mrb[37].mxu0 }
 0x1c9   : > { %v947_v8 = vpack.c.bf16 %v932_v12, %v931_v3  ;;  %v1938_v19 = vadd.f32 %v1937_v18, %v1936_v13  ;;  %v1939_v20 = vpop.f32.mrb[38].mxu0 }
 0x1ca   : > { %v1940_v21 = vpop.f32.mrb[39].mxu0 }
 0x1cb   : > { %1862 = vst [vmem:[%s2877_s9 + $0x40] sm:$0xff] %v947_v8   ;;  %v893_v23 = vadd.f32 %v2897_v22, %v1938_v19  ;;  %v1941_v14 = vadd.f32 %v1940_v21, %v1939_v20  ;;  %2086 = vmatprep.mubr.bf16.mxu1 %v947_v8 }
 0x1cd   : > { %v896_v25 = vadd.f32 %v2903_v26, %v1941_v14  ;;  %v933_v24 = vmax.f32 %v893_v23, 0.0 }
 0x1cf   : > { %v934_v15 = vmax.f32 %v896_v25, 0.0  ;;  %v1942_v28 = vpop.f32.mrb[40].mxu0 }
 0x1d0   : > { %v1943_v27 = vpop.f32.mrb[41].mxu0 }
 0x1d1   : > { %v1944_v29 = vadd.f32 %v1943_v27, %v1942_v28  ;;  %v1945_v30 = vpop.f32.mrb[42].mxu0  ;;  %v948_v31 = vpack.c.bf16 %v934_v15, %v933_v24 }
 0x1d2   : > { %v1946_v32 = vpop.f32.mrb[43].mxu0 }
 0x1d3   : > { %v1947_v33 = vadd.f32 %v1946_v32, %v1945_v30  ;;  %v901_v34 = vadd.f32 %v1944_v29, %v2910_v37  ;;  %1863 = vst [vmem:[%s2877_s9 + $0x48] sm:$0xff] %v948_v31   ;;  %2087 = vmatmul.mubr.bf16.gmra.mrb[40].mxu1 %v948_v31 }
 0x1d5   : > { %v904_v22 = vadd.f32 %v1947_v33, %v2916_v40  ;;  %v935_v36 = vmax.f32 %v901_v34, 0.0  ;;  %v2284_v40 = vld [vmem:[#allocation8 + $0x30] sm:$0xff]  }
 0x1d6   : > { %2106 = vmatprep.subr.bf16.mxu0 %v2284_v40  ;;  %2140 = vmatprep.subr.bf16.mxu1 %v2284_v40 }
 0x1d7   : > { %v936_v16 = vmax.f32 %v904_v22, 0.0  ;;  %v1948_v26 = vpop.f32.mrb[44].mxu0  ;;  %2107 = vmatpush3.bf16.msra.mxu0 %v2284_v40  ;;  %2148 = vmatpush3.bf16.msra.mxu1 %v2284_v40 }
 0x1d8   : > { %v1949_v38 = vpop.f32.mrb[45].mxu0  ;;  %2108 = vmatprep.subr.bf16.mxu0 %v2285_v49  ;;  %2141 = vmatprep.subr.bf16.mxu1 %v2285_v49 }
 0x1d9   : > { %v949_v17 = vpack.c.bf16 %v936_v16, %v935_v36  ;;  %v1950_v41 = vadd.f32 %v1949_v38, %v1948_v26  ;;  %v1951_v42 = vpop.f32.mrb[46].mxu0 }
 0x1da   : > { %v1952_v43 = vpop.f32.mrb[47].mxu0 }
 0x1db   : > { %1864 = vst [vmem:[%s2877_s9 + $0x50] sm:$0xff] %v949_v17   ;;  %v909_v44 = vadd.f32 %v2908_v35, %v1950_v41  ;;  %v1953_v45 = vadd.f32 %v1952_v43, %v1951_v42  ;;  %2090 = vmatprep.mubr.bf16.mxu1 %v949_v17  ;;  %2109 = vmatpush3.bf16.msra.mxu0 %v2285_v49  ;;  %v2938_v35 = vld [vmem:[%s3107_s3] ss:$0 sm:$0xff] }
 0x1dc   : > { %2149 = vmatpush3.bf16.msra.mxu1 %v2285_v49 }
 0x1dd   : > { %v912_v37 = vadd.f32 %v2914_v39, %v1953_v45  ;;  %v937_v46 = vmax.f32 %v909_v44, 0.0 }
 0x1df   : > { %v938_v47 = vmax.f32 %v912_v37, 0.0 }
 0x1e1   : > { %v950_v48 = vpack.c.bf16 %v938_v47, %v937_v46 }
 0x1e3   : > { %1865 = vst [vmem:[%s2877_s9 + $0x58] sm:$0xff] %v950_v48   ;;  %2091 = vmatmul.mubr.bf16.gmra.mrb[44].mxu1 %v950_v48 }
 0x266   : > { %v2072_v39 = vpop.f32.mrb[24].mxu1 }
 0x267   : > { %v1173_v50 = vadd.f32 %v2072_v39, %v2938_v35  ;;  %v1164_v51 = vpop.f32.mrb[25].mxu1 }
 0x268   : > { %v1165_v52 = vadd.f32 %v2938_v35, %v1164_v51  ;;  %v2073_v53 = vpop.f32.mrb[26].mxu1 }
 0x269   : > { %v1176_v54 = vadd.f32 %v2073_v53, %v2938_v35  ;;  %v1167_v55 = vpop.f32.mrb[27].mxu1  ;;  %v1261_v57 = vmax.f32 %v1173_v50, 0.0 }
 0x26a   : > { %v1168_v56 = vadd.f32 %v2938_v35, %v1167_v55  ;;  %v1259_v59 = vmax.f32 %v1165_v52, 0.0 }
 0x26b   : > { %v1262_v58 = vmax.f32 %v1176_v54, 0.0 }
 0x26c   : > { %v1260_v60 = vmax.f32 %v1168_v56, 0.0 }
 0x26d   : > { %v1284_v61 = vpack.c.bf16 %v1262_v58, %v1261_v57 }
 0x26e   : > { %v1283_v62 = vpack.c.bf16 %v1260_v60, %v1259_v59 }
 0x270   : > { %2110 = vmatprep.mubr.bf16.mxu0 %v1283_v62 }
 0x271   : > { %2111 = vmatmul.mubr.bf16.vlgmr.msra.gmra.mrb[48].mxu0 %v1284_v61 }
 0x276   : > { %v2076_v63 = vpop.f32.mrb[28].mxu1 }
 0x277   : > { %v1189_v0 = vadd.f32 %v2076_v63, %v2938_v35  ;;  %v1180_v1 = vpop.f32.mrb[29].mxu1 }
 0x278   : > { %v1181_v2 = vadd.f32 %v2938_v35, %v1180_v1  ;;  %v2077_v4 = vpop.f32.mrb[30].mxu1 }
 0x279   : > { %v1192_v5 = vadd.f32 %v2077_v4, %v2938_v35  ;;  %v1183_v6 = vpop.f32.mrb[31].mxu1  ;;  %v1265_v9 = vmax.f32 %v1189_v0, 0.0 }
 0x27a   : > { %v1184_v7 = vadd.f32 %v2938_v35, %v1183_v6  ;;  %v1263_v11 = vmax.f32 %v1181_v2, 0.0 }
 0x27b   : > { %v1266_v10 = vmax.f32 %v1192_v5, 0.0 }
 0x27c   : > { %v1264_v3 = vmax.f32 %v1184_v7, 0.0 }
 0x27d   : > { %v1286_v12 = vpack.c.bf16 %v1266_v10, %v1265_v9 }
 0x27e   : > { %v1285_v13 = vpack.c.bf16 %v1264_v3, %v1263_v11 }
 0x280   : > { %2114 = vmatprep.mubr.bf16.mxu0 %v1285_v13 }
 0x281   : > { %2115 = vmatmul.mubr.bf16.gmra.mrb[52].mxu0 %v1286_v12 }
 0x286   : > { %v2080_v18 = vpop.f32.mrb[32].mxu1 }
 0x287   : > { %v1205_v8 = vadd.f32 %v2080_v18, %v2938_v35  ;;  %v1196_v19 = vpop.f32.mrb[33].mxu1 }
 0x288   : > { %v1197_v20 = vadd.f32 %v2938_v35, %v1196_v19  ;;  %v2081_v21 = vpop.f32.mrb[34].mxu1 }
 0x289   : > { %v1208_v23 = vadd.f32 %v2081_v21, %v2938_v35  ;;  %v1199_v14 = vpop.f32.mrb[35].mxu1  ;;  %v1269_v24 = vmax.f32 %v1205_v8, 0.0 }
 0x28a   : > { %v1200_v25 = vadd.f32 %v2938_v35, %v1199_v14  ;;  %v1267_v28 = vmax.f32 %v1197_v20, 0.0 }
 0x28b   : > { %v1270_v15 = vmax.f32 %v1208_v23, 0.0 }
 0x28c   : > { %v1268_v27 = vmax.f32 %v1200_v25, 0.0 }
 0x28d   : > { %v1288_v29 = vpack.c.bf16 %v1270_v15, %v1269_v24 }
 0x28e   : > { %v1287_v30 = vpack.c.bf16 %v1268_v27, %v1267_v28 }
 0x290   : > { %2118 = vmatprep.mubr.bf16.mxu0 %v1287_v30 }
 0x291   : > { %2119 = vmatmul.mubr.bf16.gmra.mrb[56].mxu0 %v1288_v29 }
 0x296   : > { %v2084_v31 = vpop.f32.mrb[36].mxu1 }
 0x297   : > { %v1221_v32 = vadd.f32 %v2084_v31, %v2938_v35  ;;  %v1212_v33 = vpop.f32.mrb[37].mxu1 }
 0x298   : > { %v1213_v34 = vadd.f32 %v2938_v35, %v1212_v33  ;;  %v2085_v22 = vpop.f32.mrb[38].mxu1 }
 0x299   : > { %v1224_v36 = vadd.f32 %v2085_v22, %v2938_v35  ;;  %v1215_v16 = vpop.f32.mrb[39].mxu1  ;;  %v1273_v38 = vmax.f32 %v1221_v32, 0.0 }
 0x29a   : > { %v1216_v26 = vadd.f32 %v2938_v35, %v1215_v16  ;;  %v1271_v41 = vmax.f32 %v1213_v34, 0.0 }
 0x29b   : > { %v1274_v17 = vmax.f32 %v1224_v36, 0.0 }
 0x29c   : > { %v1272_v42 = vmax.f32 %v1216_v26, 0.0 }
 0x29d   : > { %v1290_v43 = vpack.c.bf16 %v1274_v17, %v1273_v38 }
 0x29e   : > { %v1289_v44 = vpack.c.bf16 %v1272_v42, %v1271_v41 }
 0x2a0   : > { %2122 = vmatprep.mubr.bf16.mxu1 %v1289_v44 }
 0x2a1   : > { %2123 = vmatmul.mubr.bf16.vlgmr.msra.gmra.mrb[48].mxu1 %v1290_v43 }
 0x2a6   : > { %v2088_v45 = vpop.f32.mrb[40].mxu1 }
 0x2a7   : > { %v1237_v37 = vadd.f32 %v2088_v45, %v2938_v35  ;;  %v1228_v46 = vpop.f32.mrb[41].mxu1 }
 0x2a8   : > { %v1229_v47 = vadd.f32 %v2938_v35, %v1228_v46  ;;  %v2089_v48 = vpop.f32.mrb[42].mxu1 }
 0x2a9   : > { %v1240_v40 = vadd.f32 %v2089_v48, %v2938_v35  ;;  %v1231_v49 = vpop.f32.mrb[43].mxu1  ;;  %v1277_v50 = vmax.f32 %v1237_v37, 0.0 }
 0x2aa   : > { %v1232_v39 = vadd.f32 %v2938_v35, %v1231_v49  ;;  %v1275_v52 = vmax.f32 %v1229_v47, 0.0 }
 0x2ab   : > { %v1278_v51 = vmax.f32 %v1240_v40, 0.0 }
 0x2ac   : > { %v1276_v53 = vmax.f32 %v1232_v39, 0.0 }
 0x2ad   : > { %v1292_v54 = vpack.c.bf16 %v1278_v51, %v1277_v50 }
 0x2ae   : > { %v1291_v55 = vpack.c.bf16 %v1276_v53, %v1275_v52 }
 0x2b0   : > { %2126 = vmatprep.mubr.bf16.mxu1 %v1291_v55 }
 0x2b1   : > { %2127 = vmatmul.mubr.bf16.gmra.mrb[52].mxu1 %v1292_v54 }
 0x2b6   : > { %v2092_v56 = vpop.f32.mrb[44].mxu1 }
 0x2b7   : > { %v1253_v57 = vadd.f32 %v2092_v56, %v2938_v35  ;;  %v1244_v58 = vpop.f32.mrb[45].mxu1 }
 0x2b8   : > { %v1245_v59 = vadd.f32 %v2938_v35, %v1244_v58  ;;  %v2093_v60 = vpop.f32.mrb[46].mxu1 }
 0x2b9   : > { %v1256_v61 = vadd.f32 %v2093_v60, %v2938_v35  ;;  %v1247_v62 = vpop.f32.mrb[47].mxu1  ;;  %v1281_v0 = vmax.f32 %v1253_v57, 0.0 }
 0x2ba   : > { %v1248_v63 = vadd.f32 %v2938_v35, %v1247_v62  ;;  %v1279_v2 = vmax.f32 %v1245_v59, 0.0 }
 0x2bb   : > { %v1282_v1 = vmax.f32 %v1256_v61, 0.0 }
 0x2bc   : > { %v1280_v4 = vmax.f32 %v1248_v63, 0.0 }
 0x2bd   : > { %v1294_v5 = vpack.c.bf16 %v1282_v1, %v1281_v0 }
 0x2be   : > { %v1293_v6 = vpack.c.bf16 %v1280_v4, %v1279_v2 }
 0x2c0   : > { %2130 = vmatprep.mubr.bf16.mxu1 %v1293_v6 }
 0x2c1   : > { %2131 = vmatmul.mubr.bf16.gmra.mrb[56].mxu1 %v1294_v5 }
 0x2c2   : > { %2413 = shalt.err (!%p2410_p4)
}
 0x2c3   : > { %s2414_s30 = scalar_lea.hbm %s2968_s11, 1536  ;;  %s2418_s23 = scalar_lea.hbm %s3111_s7, 3072 }
 0x2c4   : > { %p2415_p9 = scmp.ne.s32.totalorder %s2968_s11, %s2414_s30  ;;  %p2419_p8 = scmp.lt.u32.totalorder %s2968_s11, %s3111_s7 }
 0x2c5   : > { %p2420_p13 = scmp.lt.u32.totalorder %s2418_s23, %s2414_s30  ;;  %p2422_p3 = scmp.lt.u32.totalorder %s2414_s30, %s2968_s11 }
 0x2c6   : > { %p2416_p0 = pnand %p2415_p9, %p2709_p10 }
 0x2c7   : > { %p2421_p6 = por %p2420_p13, %p2419_p8 }
 0x2c8   : > { %p2417_p11 = pneg %p2416_p0 }
 0x2c9   : > { %p2423_p5 = por %p2422_p3, %p2421_p6 }
 0x2cb   : > { %p2424_p7 = pnand %p2423_p5, %p2417_p11 }
 0x2cd   : > { %2427 = shalt.err (!%p2424_p7)
}
 0x2ce   : > { %s2517_s21 = smov 64   ;;  %s2518_s15 = smov 4   ;;  %v3001_v35 = vld [vmem:[%s3109_s5] ss:$0 sm:$0xff] }
 0x2cf   : > { %2170 = dma.vmem_to_hbm [thread:$0]  (%p2709_p10), %s2971_s12, 1536, %s2968_s11, %s1525_s13, %s2517_s21, %s2517_s21, %s2518_s15  }
 0x2d0   : > { %s2153_s17 = smul.u32 192, %s2761_s29  ;;  %s2519_s14 = smov [#allocation10]  }
 0x2d1   : > { %s1793_s11 = smul.u32 3072, %s2583_s28  ;;  %s1520_s28 = scalar_lea.sflag [#allocation4], %s2761_s29 }
 0x2d2   : > { %s3005_s30 = scalar_lea.vmem [#allocation10], %s2153_s17  ;;  %s2432_s1 = sshll.u32 %s2519_s14, 4  ;;  %s2433_s1 = int_to_ptr.vmem [resolvable:$false] %s2432_s1 }
 0x2d3   : > { %s1538_s12 = sshll.u32 %s3005_s30, 4  ;;  %s3054_s10 = scalar_lea.hbm %s3110_s6, %s1793_s11  ;;  %s3056_s12 = int_to_ptr.vmem [resolvable:$true] %s1538_s12 }
 0x2d4   : > { %s2428_s23 = scalar_lea.vmem %s3056_s12, 3072  ;;  %s2434_s21 = scalar_lea.vmem %s2433_s1, 6144 }
 0x2d5   : > { %p2429_p12 = scmp.ne.s32.totalorder %s3056_s12, %s2428_s23  ;;  %p2435_p4 = scmp.lt.s32.totalorder %s3056_s12, %s2433_s1 }
 0x2d6   : > { %p2436_p9 = scmp.lt.s32.totalorder %s2434_s21, %s2428_s23 }
 0x2d7   : > { %p2430_p1 = pnand %p2429_p12, %p2709_p10 }
 0x2d8   : > { %p2437_p0 = por %p2436_p9, %p2435_p4 }
 0x2d9   : > { %p2431_p2 = pneg %p2430_p1 }
 0x2db   : > { %p2438_p11 = pnand %p2437_p0, %p2431_p2 }
 0x344   : > { %v2112_v7 = vpop.f32.mrb[48].mxu0 }
 0x345   : > { %v1409_v9 = vadd.f32 %v2112_v7, %v3001_v35  ;;  %v1400_v10 = vpop.f32.mrb[49].mxu0 }
 0x346   : > { %v1401_v11 = vadd.f32 %v3001_v35, %v1400_v10  ;;  %v2113_v3 = vpop.f32.mrb[50].mxu0 }
 0x347   : > { %1497 = vst [vmem:[%s3005_s30 + $0x10] sm:$0xff] %v1409_v9  ;;  %v1412_v12 = vadd.f32 %v2113_v3, %v3001_v35  ;;  %v1403_v13 = vpop.f32.mrb[51].mxu0 }
 0x348   : > { %1495 = vst [vmem:[%s3005_s30] sm:$0xff] %v1401_v11  ;;  %v1404_v18 = vadd.f32 %v3001_v35, %v1403_v13 }
 0x349   : > { %1498 = vst [vmem:[%s3005_s30 + $0x18] sm:$0xff] %v1412_v12 }
 0x34a   : > { %1496 = vst [vmem:[%s3005_s30 + $0x8] sm:$0xff] %v1404_v18 }
 0x354   : > { %v2116_v8 = vpop.f32.mrb[52].mxu0 }
 0x355   : > { %v1425_v19 = vadd.f32 %v2116_v8, %v3001_v35  ;;  %v1416_v20 = vpop.f32.mrb[53].mxu0 }
 0x356   : > { %v1417_v21 = vadd.f32 %v3001_v35, %v1416_v20  ;;  %v2117_v23 = vpop.f32.mrb[54].mxu0 }
 0x357   : > { %1501 = vst [vmem:[%s3005_s30 + $0x30] sm:$0xff] %v1425_v19  ;;  %v1428_v14 = vadd.f32 %v2117_v23, %v3001_v35  ;;  %v1419_v25 = vpop.f32.mrb[55].mxu0 }
 0x358   : > { %1499 = vst [vmem:[%s3005_s30 + $0x20] sm:$0xff] %v1417_v21  ;;  %v1420_v24 = vadd.f32 %v3001_v35, %v1419_v25 }
 0x359   : > { %1502 = vst [vmem:[%s3005_s30 + $0x38] sm:$0xff] %v1428_v14 }
 0x35a   : > { %1500 = vst [vmem:[%s3005_s30 + $0x28] sm:$0xff] %v1420_v24 }
 0x364   : > { %v2120_v15 = vpop.f32.mrb[56].mxu0 }
 0x365   : > { %v1441_v28 = vadd.f32 %v2120_v15, %v3001_v35  ;;  %v1432_v27 = vpop.f32.mrb[57].mxu0 }
 0x366   : > { %v1433_v29 = vadd.f32 %v3001_v35, %v1432_v27  ;;  %v2121_v30 = vpop.f32.mrb[58].mxu0 }
 0x367   : > { %1505 = vst [vmem:[%s3005_s30 + $0x50] sm:$0xff] %v1441_v28  ;;  %v1444_v31 = vadd.f32 %v2121_v30, %v3001_v35  ;;  %v1435_v32 = vpop.f32.mrb[59].mxu0 }
 0x368   : > { %1503 = vst [vmem:[%s3005_s30 + $0x40] sm:$0xff] %v1433_v29  ;;  %v1436_v33 = vadd.f32 %v3001_v35, %v1435_v32 }
 0x369   : > { %1506 = vst [vmem:[%s3005_s30 + $0x58] sm:$0xff] %v1444_v31 }
 0x36a   : > { %1504 = vst [vmem:[%s3005_s30 + $0x48] sm:$0xff] %v1436_v33 }
 0x374   : > { %v2124_v34 = vpop.f32.mrb[48].mxu1 }
 0x375   : > { %v1457_v22 = vadd.f32 %v2124_v34, %v3001_v35  ;;  %v1448_v36 = vpop.f32.mrb[49].mxu1 }
 0x376   : > { %v1449_v16 = vadd.f32 %v3001_v35, %v1448_v36  ;;  %v2125_v26 = vpop.f32.mrb[50].mxu1 }
 0x377   : > { %1509 = vst [vmem:[%s3005_s30 + $0x70] sm:$0xff] %v1457_v22  ;;  %v1460_v38 = vadd.f32 %v2125_v26, %v3001_v35  ;;  %v1451_v17 = vpop.f32.mrb[51].mxu1 }
 0x378   : > { %1507 = vst [vmem:[%s3005_s30 + $0x60] sm:$0xff] %v1449_v16  ;;  %v1452_v41 = vadd.f32 %v3001_v35, %v1451_v17 }
 0x379   : > { %1510 = vst [vmem:[%s3005_s30 + $0x78] sm:$0xff] %v1460_v38 }
 0x37a   : > { %1508 = vst [vmem:[%s3005_s30 + $0x68] sm:$0xff] %v1452_v41 }
 0x384   : > { %v2128_v42 = vpop.f32.mrb[52].mxu1 }
 0x385   : > { %v1473_v43 = vadd.f32 %v2128_v42, %v3001_v35  ;;  %v1464_v44 = vpop.f32.mrb[53].mxu1 }
 0x386   : > { %v1465_v45 = vadd.f32 %v3001_v35, %v1464_v44  ;;  %v2129_v37 = vpop.f32.mrb[54].mxu1 }
 0x387   : > { %1513 = vst [vmem:[%s3005_s30 + $0x90] sm:$0xff] %v1473_v43  ;;  %v1476_v46 = vadd.f32 %v2129_v37, %v3001_v35  ;;  %v1467_v47 = vpop.f32.mrb[55].mxu1 }
 0x388   : > { %1511 = vst [vmem:[%s3005_s30 + $0x80] sm:$0xff] %v1465_v45  ;;  %v1468_v48 = vadd.f32 %v3001_v35, %v1467_v47 }
 0x389   : > { %1514 = vst [vmem:[%s3005_s30 + $0x98] sm:$0xff] %v1476_v46 }
 0x38a   : > { %1512 = vst [vmem:[%s3005_s30 + $0x88] sm:$0xff] %v1468_v48 }
 0x394   : > { %v2132_v40 = vpop.f32.mrb[56].mxu1 }
 0x395   : > { %v1489_v49 = vadd.f32 %v2132_v40, %v3001_v35  ;;  %v1480_v39 = vpop.f32.mrb[57].mxu1 }
 0x396   : > { %v1481_v50 = vadd.f32 %v3001_v35, %v1480_v39  ;;  %v2133_v51 = vpop.f32.mrb[58].mxu1 }
 0x397   : > { %1517 = vst [vmem:[%s3005_s30 + $0xb0] sm:$0xff] %v1489_v49  ;;  %v1492_v52 = vadd.f32 %v2133_v51, %v3001_v35  ;;  %v1483_v53 = vpop.f32.mrb[59].mxu1 }
 0x398   : > { %1515 = vst [vmem:[%s3005_s30 + $0xa0] sm:$0xff] %v1481_v50  ;;  %v1484_v54 = vadd.f32 %v3001_v35, %v1483_v53 }
 0x399   : > { %1518 = vst [vmem:[%s3005_s30 + $0xb8] sm:$0xff] %v1492_v52 }
 0x39a   : > { %1516 = vst [vmem:[%s3005_s30 + $0xa8] sm:$0xff] %v1484_v54 }
 0x39b   : > { %2441 = shalt.err (!%p2438_p11)
}
 0x39c   : > { %s2442_s15 = scalar_lea.hbm %s3054_s10, 3072  ;;  %s2446_s19 = scalar_lea.hbm %s3110_s6, 6144 }
 0x39d   : > { %p2443_p8 = scmp.ne.s32.totalorder %s3054_s10, %s2442_s15  ;;  %p2447_p3 = scmp.lt.u32.totalorder %s3054_s10, %s3110_s6 }
 0x39e   : > { %p2448_p5 = scmp.lt.u32.totalorder %s2446_s19, %s2442_s15  ;;  %p2450_p12 = scmp.lt.u32.totalorder %s2442_s15, %s3054_s10 }
 0x39f   : > { %p2444_p13 = pnand %p2443_p8, %p2709_p10 }
 0x3a0   : > { %p2449_p7 = por %p2448_p5, %p2447_p3 }
 0x3a1   : > { %p2445_p6 = pneg %p2444_p13 }
 0x3a2   : > { %p2451_p1 = por %p2450_p12, %p2449_p7 }
 0x3a4   : > { %p2452_p2 = pnand %p2451_p1, %p2445_p6 }
 0x3a6   : > { %2455 = shalt.err (!%p2452_p2)
}
 0x3a7   : > { %s2520_s13 = smov 128   ;;  %s2521_s9 = smov 8  }
 0x3a8   : > { %2169 = dma.vmem_to_hbm [thread:$0]  (%p2709_p10), %s3056_s12, 3072, %s3054_s10, %s1520_s28, %s2520_s13, %s2520_s13, %s2521_s9  }
 0x3a9 PF: > { %s1569_s23 = sand.u32 1, %s2494_s24   ;;  %p3131_p4 = scmp.ne.s32.totalorder %s3117_s8, 0 }
 0x3aa   : > { %p3132_p9 = scmp.ge.s32.totalorder %s2506_s27, 2  ;;  %s1570_s14 = scalar_lea.sflag [#allocation4], %s1569_s23 }
 0x3ac   : > { %p2188_p0 = pnand %p3132_p9, %p3131_p4 }
 0x3ae   : > { %2485 = dma.done.wait (!%p2188_p0), %s1570_s14, 3072  }
 0x3af   : > { %2487 = vsyncadd (!%p2188_p0), %s1570_s14, 4294964224  ;;  %s1579_s1 = scalar_lea.sflag [#allocation12], %s1569_s23 }
 0x3b0   : > { %2489 = dma.done.wait (!%p2188_p0), %s1579_s1, 1536  }
 0x3b1   : > { %2491 = vsyncadd (!%p2188_p0), %s1579_s1, 4294965760  ;;  %p26_p10 = scmp.ge.s32.totalorder %s2699_s20, 4   ;;  %s3133_s24 = smov %s2498_s25 }
 0x3b2   : > { %s3134_s25 = smov %s2502_s26  ;;  %s3135_s26 = smov %s2715_s18 }
 0x3b3   : > { %s3136_s27 = smov %s2699_s20  ;;  %28 = sbr.rel (!%p26_p10) target bundleno = 11 (0xb), region = 118 }
 0x3ba   :  { %1584 = vsyncpa [#allocation3], 1 }
 0x3bb   :  { %1586 = vsyncpa [#allocation3 + $0x1], 1 }
 0x3bc   :  { %1587 = vsyncpa [#allocation6], 1 }
 0x3bd   :  { %1588 = vsyncpa [#allocation9], 1 }
 0x3be   :  { %1589 = vsyncpa [#allocation4], 1 }
 0x3bf   :  { %1591 = vsyncpa [#allocation4 + $0x1], 1 }
 0x3c0   :  { %1592 = vsyncpa [#allocation12], 1 }
 0x3c1   :  { %1594 = vsyncpa [#allocation12 + $0x1], 1 }

</bundles_post_ra>
